<compile_context>
chip_gen: v5e
topology: v5e:2x2
jax: 0.10.0
libtpu: 0.0.40
codegen_flags: <defaults>
</compile_context>

<pallas_src>
import jax
import jax.numpy as jnp
import numpy as np
from jax.experimental import pallas as pl
from jax.experimental.pallas import tpu as pltpu  # noqa: F401  (TPU backend assumed)

HIDDEN = 32            # hidden_channels
D4 = 4 * HIDDEN        # 128  (lane aligned)
D8 = 8 * HIDDEN        # 256  (lane aligned)
HEAD_PAD = 128         # lane-dense head-output slab; cols 0/1/2 = W / pack / SC

NODE_TYPES = ('Warehouse', 'SortingCenter')
OUT_TYPES = ('Warehouse', 'pack', 'SortingCenter')


# ----------------------------- fused kernel -------------------------------- #

def _hg_fused_kernel(
    x_wh_ref, x_sc_ref,                 # concatenated node features [Nwh,4H], [S,4H]
    mwh_ref, msc_ref, mm_ref,           # masks: [R,Nwh], [R,S], combined [R,S]
    cmaskf_ref, dmask_ref,              # cmask flattened [R*S,S], dmask [R,S]
    wctx_ref, bctx_ref,                 # fc_context  [4H,4H], [1,4H]
    wdown_ref, bdown_ref,               # fc_down     [4H,4H], [1,4H]
    w1wp_ref, b1wp_ref,                 # hid Warehouse|pack  [8H,2*8H], [1,2*8H]
    w1sc_ref, b1sc_ref,                 # hid SortingCenter   [8H,8H],   [1,8H]
    w2a_ref, w2b_ref, b2_ref,           # packed output heads [2*8H,128],[8H,128],[1,128]
    heads_ref, xdown_ref, ctx_ref):     # outputs: [R,128], [R,4H], [R*S,4H]
    f32 = jnp.float32
    x_sc = x_sc_ref[...]

    # fc_context / fc_down on shared sorting-center features -> [S, 4H]
    x_ctx = jnp.dot(x_sc, wctx_ref[...], preferred_element_type=f32) + bctx_ref[...]
    x_dwn = jnp.dot(x_sc, wdown_ref[...], preferred_element_type=f32) + bdown_ref[...]

    # x_warehouse = mask_in['Warehouse'] @ x_all['Warehouse'] -> [R, 4H]
    x_wh = jnp.dot(mwh_ref[...], x_wh_ref[...], preferred_element_type=f32)

    # x_down = dmask @ x_down -> [R, 4H]   (communicate_client output)
    x_down = jnp.dot(dmask_ref[...], x_dwn, preferred_element_type=f32)
    xdown_ref[...] = x_down

    # x_context = cmask @ x_context -> [R*S, 4H]   (communicate_client output)
    ctx_ref[...] = jnp.dot(cmaskf_ref[...], x_ctx, preferred_element_type=f32)

    # x_out3 = sum_s m[r,s] * cat(x_sc[s], x_context[r,s])  -- both halves on MXU
    x3a = jnp.dot(msc_ref[...], x_sc, preferred_element_type=f32)    # [R, 4H]
    x3b = jnp.dot(mm_ref[...], x_ctx, preferred_element_type=f32)    # [R, 4H]

    # Batched heads.  x_out1 = cat(x_wh, x_down) is never materialized:
    #   x_out1 @ W1 == x_wh @ W1[:4H] + x_down @ W1[4H:]
    h12 = jnp.dot(x_wh, w1wp_ref[:D4, :], preferred_element_type=f32)
    h12 = h12 + jnp.dot(x_down, w1wp_ref[D4:, :], preferred_element_type=f32)
    h12 = jnp.maximum(h12 + b1wp_ref[...], 0.0)                       # [R, 2*8H]

    h3 = jnp.dot(x3a, w1sc_ref[:D4, :], preferred_element_type=f32)
    h3 = h3 + jnp.dot(x3b, w1sc_ref[D4:, :], preferred_element_type=f32)
    h3 = jnp.maximum(h3 + b1sc_ref[...], 0.0)                         # [R, 8H]

    # Second stage: block-diagonal packed (8H,1) head weights -> one lane-dense
    # [R, 128] slab (cols 0/1/2 carry the three heads, rest are exact zeros).
    heads_ref[...] = (jnp.dot(h12, w2a_ref[...], preferred_element_type=f32)
                      + jnp.dot(h3, w2b_ref[...], preferred_element_type=f32)
                      + b2_ref[...])


# ------------------------- params & packing --------------------------------- #

def init_params(key):
    """Reference-layout parameters (mirrors the torch module)."""
    def lin(k, din, dout, scale=0.05):
        kw, kb = jax.random.split(k)
        w = scale * jax.random.normal(kw, (din, dout), jnp.float32)
        b = scale * jax.random.normal(kb, (1, dout), jnp.float32)
        return (w, b)

    keys = jax.random.split(key, 2 + 2 * len(OUT_TYPES))
    params = {'fc_down': lin(keys[0], D4, D4),
              'fc_context': lin(keys[1], D4, D4),
              'hid': {}, 'out': {}}
    for i, t in enumerate(OUT_TYPES):
        params['hid'][t] = lin(keys[2 + 2 * i], D8, D8)
        params['out'][t] = lin(keys[3 + 2 * i], D8, 1)   # Linear(-1, 1) -> (8H, 1)
    return params


def pack_params(params):
    """Repack reference params into the fused-kernel layout (done once)."""
    w1_wp = jnp.concatenate([params['hid']['Warehouse'][0],
                             params['hid']['pack'][0]], axis=1)      # [8H, 2*8H]
    b1_wp = jnp.concatenate([params['hid']['Warehouse'][1],
                             params['hid']['pack'][1]], axis=1)      # [1, 2*8H]
    w1_sc, b1_sc = params['hid']['SortingCenter']

    # Block-diagonal, lane-padded second-stage weights: column 0 = Warehouse,
    # column 1 = pack, column 2 = SortingCenter, columns 3..127 = 0.
    w2a = jnp.zeros((2 * D8, HEAD_PAD), jnp.float32)
    w2a = w2a.at[:D8, 0].set(params['out']['Warehouse'][0][:, 0])
    w2a = w2a.at[D8:, 1].set(params['out']['pack'][0][:, 0])
    w2b = jnp.zeros((D8, HEAD_PAD), jnp.float32)
    w2b = w2b.at[:, 2].set(params['out']['SortingCenter'][0][:, 0])
    b2 = jnp.zeros((1, HEAD_PAD), jnp.float32)
    b2 = b2.at[0, 0].set(params['out']['Warehouse'][1][0, 0])
    b2 = b2.at[0, 1].set(params['out']['pack'][1][0, 0])
    b2 = b2.at[0, 2].set(params['out']['SortingCenter'][1][0, 0])

    return {'fc_context': params['fc_context'], 'fc_down': params['fc_down'],
            'w1_wp': w1_wp, 'b1_wp': b1_wp, 'w1_sc': w1_sc, 'b1_sc': b1_sc,
            'w2a': w2a, 'w2b': w2b, 'b2': b2}


# ------------------------------ forward ------------------------------------- #

def hg_prediction_forward(packed, xs, xt, xst, mask_in, cmask, dmask, mask_pack_in):
    del mask_pack_in  # accepted but unused by the reference forward

    # Feature concatenation done once, lane-dense (128 wide), feeding the kernel.
    x_wh_all = jnp.concatenate([xs['Warehouse'], xt['Warehouse'], xst['Warehouse']], axis=1)
    x_sc_all = jnp.concatenate([xs['SortingCenter'], xt['SortingCenter'], xst['SortingCenter']], axis=1)

    R, S, _ = cmask.shape
    mask_sc = mask_in['SortingCenter'].reshape(R, S)
    cmask_flat = cmask.reshape(R * S, S)
    # Combined mask (depends only on inputs):
    #   sum_s m[r,s] * (cmask[r,s,:] @ x_ctx) == mm[r,:] @ x_ctx
    mm = jnp.einsum('rs,rst->rt', mask_sc, cmask)

    wctx, bctx = packed['fc_context']
    wdown, bdown = packed['fc_down']

    # No grid -> whole arrays as single VMEM blocks (everything here is tiny);
    # one launch, all intermediates stay on-chip.
    heads, x_down, ctx_flat = pl.pallas_call(
        _hg_fused_kernel,
        out_shape=(
            jax.ShapeDtypeStruct((R, HEAD_PAD), jnp.float32),
            jax.ShapeDtypeStruct((R, D4), jnp.float32),
            jax.ShapeDtypeStruct((R * S, D4), jnp.float32),
        ),
    )(x_wh_all, x_sc_all,
      mask_in['Warehouse'], mask_sc, mm,
      cmask_flat, dmask,
      wctx, bctx, wdown, bdown,
      packed['w1_wp'], packed['b1_wp'], packed['w1_sc'], packed['b1_sc'],
      packed['w2a'], packed['w2b'], packed['b2'])

    f_out = {'Warehouse': heads[:, 0:1],
             'pack': heads[:, 1:2],
             'SortingCenter': heads[:, 2:3]}
    communicate_client = {'x_down_to_client': x_down,
                          'x_context_to_client': ctx_flat.reshape(R, S, D4)}
    return f_out, communicate_client


# ----------------------- pure-JAX reference (for checking) ------------------ #

def hg_prediction_reference(params, xs, xt, xst, mask_in, cmask, dmask, mask_pack_in):
    x_all = {t: jnp.concatenate([xs[t], xt[t], xst[t]], axis=1) for t in NODE_TYPES}
    x_warehouse = mask_in['Warehouse'] @ x_all['Warehouse']
    wc, bc = params['fc_context']
    wd, bd = params['fc_down']
    x_context = x_all['SortingCenter'] @ wc + bc
    x_down = x_all['SortingCenter'] @ wd + bd
    x_context = jnp.matmul(cmask, x_context)        # [R, S, 4H]
    x_down = dmask @ x_down                         # [R, 4H]
    x_out1 = jnp.concatenate([x_warehouse, x_down], axis=1)
    R, S = cmask.shape[0], cmask.shape[1]
    x_all_sc = jnp.broadcast_to(x_all['SortingCenter'][None], (R, S, D4))
    x_out3 = jnp.concatenate([x_all_sc, x_context], axis=2)
    x_out3 = jnp.sum(x_out3 * mask_in['SortingCenter'].reshape(R, S, 1), axis=1)
    x_out = {'Warehouse': x_out1, 'pack': x_out1, 'SortingCenter': x_out3}
    f_out = {}
    for t in x_out:
        w1, b1 = params['hid'][t]
        w2, b2 = params['out'][t]
        h = jnp.maximum(x_out[t] @ w1 + b1, 0.0)
        f_out[t] = h @ w2 + b2
    return f_out, {'x_down_to_client': x_down, 'x_context_to_client': x_context}


# ------------------------------- main --------------------------------------- #

if __name__ == "__main__":
    key = jax.random.PRNGKey(0)
    k_param, k_in = jax.random.split(key)
    params = init_params(k_param)
    packed = pack_params(params)

    R, N_WH, N_SC = 8, 8, 8
    ks = jax.random.split(k_in, 11)

    xs = {'Warehouse': jax.random.normal(ks[0], (N_WH, HIDDEN), jnp.float32),
          'SortingCenter': jax.random.normal(ks[1], (N_SC, HIDDEN), jnp.float32)}
    xt = {'Warehouse': jax.random.normal(ks[2], (N_WH, HIDDEN), jnp.float32),
          'SortingCenter': jax.random.normal(ks[3], (N_SC, HIDDEN), jnp.float32)}
    xst = {'Warehouse': jax.random.normal(ks[4], (N_WH, 2 * HIDDEN), jnp.float32),
           'SortingCenter': jax.random.normal(ks[5], (N_SC, 2 * HIDDEN), jnp.float32)}
    mask_in = {
        'Warehouse': (jax.random.uniform(ks[6], (R, N_WH)) > 0.5).astype(jnp.float32),
        'SortingCenter': (jax.random.uniform(ks[7], (R, N_SC)) > 0.5).astype(jnp.float32),
    }
    cmask = (jax.random.uniform(ks[8], (R, N_SC, N_SC)) > 0.5).astype(jnp.float32)
    dmask = (jax.random.uniform(ks[9], (R, N_SC)) > 0.5).astype(jnp.float32)
    mask_pack_in = (jax.random.uniform(ks[10], (R, N_SC)) > 0.5).astype(jnp.float32)

    fwd = jax.jit(hg_prediction_forward)
    f_out, comm = fwd(packed, xs, xt, xst, mask_in, cmask, dmask, mask_pack_in)
    jax.block_until_ready((f_out, comm))

    # Shape checks (reference contract).
    for t in OUT_TYPES:
        assert f_out[t].shape == (R, 1), f_out[t].shape
    assert comm['x_down_to_client'].shape == (R, D4)
    assert comm['x_context_to_client'].shape == (R, N_SC, D4)

    # Numerical check against a pure-JAX reference (loose tol: MXU pass structure
    # differs between the fused kernel and the XLA reference).
    f_ref, comm_ref = hg_prediction_reference(
        params, xs, xt, xst, mask_in, cmask, dmask, mask_pack_in)
    for t in OUT_TYPES:
        np.testing.assert_allclose(np.asarray(f_out[t]), np.asarray(f_ref[t]),
                                   rtol=5e-2, atol=5e-2)
    np.testing.assert_allclose(np.asarray(comm['x_down_to_client']),
                               np.asarray(comm_ref['x_down_to_client']),
                               rtol=5e-2, atol=5e-2)
    np.testing.assert_allclose(np.asarray(comm['x_context_to_client']),
                               np.asarray(comm_ref['x_context_to_client']),
                               rtol=5e-2, atol=5e-2)

    print("KERNEL_OK")
</pallas_src>

<mosaic_0001>
module attributes {stable_mosaic.version = 11 : i64} {
  func.func @_hg_fused_kernel(%arg0: memref<8x128xf32, #tpu.memory_space<vmem>>, %arg1: memref<8x128xf32, #tpu.memory_space<vmem>>, %arg2: memref<8x8xf32, #tpu.memory_space<vmem>>, %arg3: memref<8x8xf32, #tpu.memory_space<vmem>>, %arg4: memref<8x8xf32, #tpu.memory_space<vmem>>, %arg5: memref<64x8xf32, #tpu.memory_space<vmem>>, %arg6: memref<8x8xf32, #tpu.memory_space<vmem>>, %arg7: memref<128x128xf32, #tpu.memory_space<vmem>>, %arg8: memref<1x128xf32, #tpu.memory_space<vmem>>, %arg9: memref<128x128xf32, #tpu.memory_space<vmem>>, %arg10: memref<1x128xf32, #tpu.memory_space<vmem>>, %arg11: memref<256x512xf32, #tpu.memory_space<vmem>>, %arg12: memref<1x512xf32, #tpu.memory_space<vmem>>, %arg13: memref<256x256xf32, #tpu.memory_space<vmem>>, %arg14: memref<1x256xf32, #tpu.memory_space<vmem>>, %arg15: memref<512x128xf32, #tpu.memory_space<vmem>>, %arg16: memref<256x128xf32, #tpu.memory_space<vmem>>, %arg17: memref<1x128xf32, #tpu.memory_space<vmem>>, %arg18: memref<8x128xf32, #tpu.memory_space<vmem>>, %arg19: memref<8x128xf32, #tpu.memory_space<vmem>>, %arg20: memref<64x128xf32, #tpu.memory_space<vmem>>) attributes {dimension_semantics = [], scalar_prefetch = 0 : i64, scratch_operands = 0 : i64, tpu.core_type = #tpu.core_type<tc>} {
    %c0 = arith.constant 0 : index
    %c0_0 = arith.constant 0 : index
    %0 = vector.load %arg1[%c0, %c0_0] : memref<8x128xf32, #tpu.memory_space<vmem>>, vector<8x128xf32>
    %c0_1 = arith.constant 0 : index
    %c0_2 = arith.constant 0 : index
    %1 = vector.load %arg7[%c0_1, %c0_2] : memref<128x128xf32, #tpu.memory_space<vmem>>, vector<128x128xf32>
    %cst = arith.constant dense<0.000000e+00> : vector<8x128xf32>
    %2 = tpu.matmul %0, %1, %cst {dimension_numbers = #tpu.dot_dimension_numbers<[1], [0], [0], [1], [0, 0, 1, 1], [], []>} : vector<8x128xf32>, vector<128x128xf32>, vector<8x128xf32> -> vector<8x128xf32>
    %c0_3 = arith.constant 0 : index
    %c0_4 = arith.constant 0 : index
    %3 = vector.load %arg8[%c0_3, %c0_4] : memref<1x128xf32, #tpu.memory_space<vmem>>, vector<1x128xf32>
    %4 = vector.broadcast %3 : vector<1x128xf32> to vector<8x128xf32>
    %5 = arith.addf %2, %4 : vector<8x128xf32>
    %c0_5 = arith.constant 0 : index
    %c0_6 = arith.constant 0 : index
    %6 = vector.load %arg9[%c0_5, %c0_6] : memref<128x128xf32, #tpu.memory_space<vmem>>, vector<128x128xf32>
    %cst_7 = arith.constant dense<0.000000e+00> : vector<8x128xf32>
    %7 = tpu.matmul %0, %6, %cst_7 {dimension_numbers = #tpu.dot_dimension_numbers<[1], [0], [0], [1], [0, 0, 1, 1], [], []>} : vector<8x128xf32>, vector<128x128xf32>, vector<8x128xf32> -> vector<8x128xf32>
    %c0_8 = arith.constant 0 : index
    %c0_9 = arith.constant 0 : index
    %8 = vector.load %arg10[%c0_8, %c0_9] : memref<1x128xf32, #tpu.memory_space<vmem>>, vector<1x128xf32>
    %9 = vector.broadcast %8 : vector<1x128xf32> to vector<8x128xf32>
    %10 = arith.addf %7, %9 : vector<8x128xf32>
    %c0_10 = arith.constant 0 : index
    %c0_11 = arith.constant 0 : index
    %11 = vector.load %arg2[%c0_10, %c0_11] : memref<8x8xf32, #tpu.memory_space<vmem>>, vector<8x8xf32>
    %c0_12 = arith.constant 0 : index
    %c0_13 = arith.constant 0 : index
    %12 = vector.load %arg0[%c0_12, %c0_13] : memref<8x128xf32, #tpu.memory_space<vmem>>, vector<8x128xf32>
    %cst_14 = arith.constant dense<0.000000e+00> : vector<8x128xf32>
    %13 = tpu.matmul %11, %12, %cst_14 {dimension_numbers = #tpu.dot_dimension_numbers<[1], [0], [0], [1], [0, 0, 1, 1], [], []>} : vector<8x8xf32>, vector<8x128xf32>, vector<8x128xf32> -> vector<8x128xf32>
    %c0_15 = arith.constant 0 : index
    %c0_16 = arith.constant 0 : index
    %14 = vector.load %arg6[%c0_15, %c0_16] : memref<8x8xf32, #tpu.memory_space<vmem>>, vector<8x8xf32>
    %cst_17 = arith.constant dense<0.000000e+00> : vector<8x128xf32>
    %15 = tpu.matmul %14, %10, %cst_17 {dimension_numbers = #tpu.dot_dimension_numbers<[1], [0], [0], [1], [0, 0, 1, 1], [], []>} : vector<8x8xf32>, vector<8x128xf32>, vector<8x128xf32> -> vector<8x128xf32>
    %c0_18 = arith.constant 0 : index
    %c0_19 = arith.constant 0 : index
    %16 = vector.load %arg19[%c0_18, %c0_19] : memref<8x128xf32, #tpu.memory_space<vmem>>, vector<8x128xf32>
    tpu.vector_store %arg19[%c0_18, %c0_19], %15 {strides = array<i32>} : memref<8x128xf32, #tpu.memory_space<vmem>>, vector<8x128xf32>,
    %c0_20 = arith.constant 0 : index
    %c0_21 = arith.constant 0 : index
    %17 = vector.load %arg5[%c0_20, %c0_21] : memref<64x8xf32, #tpu.memory_space<vmem>>, vector<64x8xf32>
    %cst_22 = arith.constant dense<0.000000e+00> : vector<64x128xf32>
    %18 = tpu.matmul %17, %5, %cst_22 {dimension_numbers = #tpu.dot_dimension_numbers<[1], [0], [0], [1], [0, 0, 1, 1], [], []>} : vector<64x8xf32>, vector<8x128xf32>, vector<64x128xf32> -> vector<64x128xf32>
    %c0_23 = arith.constant 0 : index
    %c0_24 = arith.constant 0 : index
    %19 = vector.load %arg20[%c0_23, %c0_24] : memref<64x128xf32, #tpu.memory_space<vmem>>, vector<64x128xf32>
    tpu.vector_store %arg20[%c0_23, %c0_24], %18 {strides = array<i32>} : memref<64x128xf32, #tpu.memory_space<vmem>>, vector<64x128xf32>,
    %c0_25 = arith.constant 0 : index
    %c0_26 = arith.constant 0 : index
    %20 = vector.load %arg3[%c0_25, %c0_26] : memref<8x8xf32, #tpu.memory_space<vmem>>, vector<8x8xf32>
    %cst_27 = arith.constant dense<0.000000e+00> : vector<8x128xf32>
    %21 = tpu.matmul %20, %0, %cst_27 {dimension_numbers = #tpu.dot_dimension_numbers<[1], [0], [0], [1], [0, 0, 1, 1], [], []>} : vector<8x8xf32>, vector<8x128xf32>, vector<8x128xf32> -> vector<8x128xf32>
    %c0_28 = arith.constant 0 : index
    %c0_29 = arith.constant 0 : index
    %22 = vector.load %arg4[%c0_28, %c0_29] : memref<8x8xf32, #tpu.memory_space<vmem>>, vector<8x8xf32>
    %cst_30 = arith.constant dense<0.000000e+00> : vector<8x128xf32>
    %23 = tpu.matmul %22, %5, %cst_30 {dimension_numbers = #tpu.dot_dimension_numbers<[1], [0], [0], [1], [0, 0, 1, 1], [], []>} : vector<8x8xf32>, vector<8x128xf32>, vector<8x128xf32> -> vector<8x128xf32>
    %c0_31 = arith.constant 0 : index
    %c0_32 = arith.constant 0 : index
    %24 = vector.load %arg11[%c0_31, %c0_32] : memref<256x512xf32, #tpu.memory_space<vmem>>, vector<128x512xf32>
    %cst_33 = arith.constant dense<0.000000e+00> : vector<8x512xf32>
    %25 = tpu.matmul %13, %24, %cst_33 {dimension_numbers = #tpu.dot_dimension_numbers<[1], [0], [0], [1], [0, 0, 1, 1], [], []>} : vector<8x128xf32>, vector<128x512xf32>, vector<8x512xf32> -> vector<8x512xf32>
    %c128 = arith.constant 128 : index
    %c0_34 = arith.constant 0 : index
    %26 = vector.load %arg11[%c128, %c0_34] : memref<256x512xf32, #tpu.memory_space<vmem>>, vector<128x512xf32>
    %cst_35 = arith.constant dense<0.000000e+00> : vector<8x512xf32>
    %27 = tpu.matmul %15, %26, %cst_35 {dimension_numbers = #tpu.dot_dimension_numbers<[1], [0], [0], [1], [0, 0, 1, 1], [], []>} : vector<8x128xf32>, vector<128x512xf32>, vector<8x512xf32> -> vector<8x512xf32>
    %28 = arith.addf %25, %27 : vector<8x512xf32>
    %c0_36 = arith.constant 0 : index
    %c0_37 = arith.constant 0 : index
    %29 = vector.load %arg12[%c0_36, %c0_37] : memref<1x512xf32, #tpu.memory_space<vmem>>, vector<1x512xf32>
    %30 = vector.broadcast %29 : vector<1x512xf32> to vector<8x512xf32>
    %31 = arith.addf %28, %30 : vector<8x512xf32>
    %cst_38 = arith.constant 0.000000e+00 : f32
    %32 = vector.broadcast %cst_38 : f32 to vector<8x512xf32>
    %33 = arith.maximumf %31, %32 : vector<8x512xf32>
    %c0_39 = arith.constant 0 : index
    %c0_40 = arith.constant 0 : index
    %34 = vector.load %arg13[%c0_39, %c0_40] : memref<256x256xf32, #tpu.memory_space<vmem>>, vector<128x256xf32>
    %cst_41 = arith.constant dense<0.000000e+00> : vector<8x256xf32>
    %35 = tpu.matmul %21, %34, %cst_41 {dimension_numbers = #tpu.dot_dimension_numbers<[1], [0], [0], [1], [0, 0, 1, 1], [], []>} : vector<8x128xf32>, vector<128x256xf32>, vector<8x256xf32> -> vector<8x256xf32>
    %c128_42 = arith.constant 128 : index
    %c0_43 = arith.constant 0 : index
    %36 = vector.load %arg13[%c128_42, %c0_43] : memref<256x256xf32, #tpu.memory_space<vmem>>, vector<128x256xf32>
    %cst_44 = arith.constant dense<0.000000e+00> : vector<8x256xf32>
    %37 = tpu.matmul %23, %36, %cst_44 {dimension_numbers = #tpu.dot_dimension_numbers<[1], [0], [0], [1], [0, 0, 1, 1], [], []>} : vector<8x128xf32>, vector<128x256xf32>, vector<8x256xf32> -> vector<8x256xf32>
    %38 = arith.addf %35, %37 : vector<8x256xf32>
    %c0_45 = arith.constant 0 : index
    %c0_46 = arith.constant 0 : index
    %39 = vector.load %arg14[%c0_45, %c0_46] : memref<1x256xf32, #tpu.memory_space<vmem>>, vector<1x256xf32>
    %40 = vector.broadcast %39 : vector<1x256xf32> to vector<8x256xf32>
    %41 = arith.addf %38, %40 : vector<8x256xf32>
    %cst_47 = arith.constant 0.000000e+00 : f32
    %42 = vector.broadcast %cst_47 : f32 to vector<8x256xf32>
    %43 = arith.maximumf %41, %42 : vector<8x256xf32>
    %c0_48 = arith.constant 0 : index
    %c0_49 = arith.constant 0 : index
    %44 = vector.load %arg15[%c0_48, %c0_49] : memref<512x128xf32, #tpu.memory_space<vmem>>, vector<512x128xf32>
    %cst_50 = arith.constant dense<0.000000e+00> : vector<8x128xf32>
    %45 = tpu.matmul %33, %44, %cst_50 {dimension_numbers = #tpu.dot_dimension_numbers<[1], [0], [0], [1], [0, 0, 1, 1], [], []>} : vector<8x512xf32>, vector<512x128xf32>, vector<8x128xf32> -> vector<8x128xf32>
    %c0_51 = arith.constant 0 : index
    %c0_52 = arith.constant 0 : index
    %46 = vector.load %arg16[%c0_51, %c0_52] : memref<256x128xf32, #tpu.memory_space<vmem>>, vector<256x128xf32>
    %cst_53 = arith.constant dense<0.000000e+00> : vector<8x128xf32>
    %47 = tpu.matmul %43, %46, %cst_53 {dimension_numbers = #tpu.dot_dimension_numbers<[1], [0], [0], [1], [0, 0, 1, 1], [], []>} : vector<8x256xf32>, vector<256x128xf32>, vector<8x128xf32> -> vector<8x128xf32>
    %48 = arith.addf %45, %47 : vector<8x128xf32>
    %c0_54 = arith.constant 0 : index
    %c0_55 = arith.constant 0 : index
    %49 = vector.load %arg17[%c0_54, %c0_55] : memref<1x128xf32, #tpu.memory_space<vmem>>, vector<1x128xf32>
    %50 = vector.broadcast %49 : vector<1x128xf32> to vector<8x128xf32>
    %51 = arith.addf %48, %50 : vector<8x128xf32>
    %c0_56 = arith.constant 0 : index
    %c0_57 = arith.constant 0 : index
    %52 = vector.load %arg18[%c0_56, %c0_57] : memref<8x128xf32, #tpu.memory_space<vmem>>, vector<8x128xf32>
    tpu.vector_store %arg18[%c0_56, %c0_57], %51 {strides = array<i32>} : memref<8x128xf32, #tpu.memory_space<vmem>>, vector<8x128xf32>,
    return
  }
}

</mosaic_0001>

<bundles_post_ra>
// kernel: hg_prediction_forward.1
= control target key start
LH: loop header
LB: loop body
LE: loop exit
PB: predicated region body
PF: predicated region fallthrough
CT: control target
= control target key end

     0   :  { %s1612_s0 = inlined_call_operand.vmem [shape: f32[8,128], index: 0, kind: input, shape index: {}]   ;;  %s1613_s1 = inlined_call_operand.vmem [shape: f32[8,128], index: 1, kind: input, shape index: {}]   ;;  %s1614_s2 = inlined_call_operand.vmem [shape: f32[8,8], index: 2, kind: input, shape index: {}]   ;;  %s1615_s3 = inlined_call_operand.vmem [shape: f32[8,8], index: 3, kind: input, shape index: {}]   ;;  %s1616_s4 = inlined_call_operand.vmem [shape: f32[8,8], index: 4, kind: input, shape index: {}]   ;;  %s1617_s5 = inlined_call_operand.vmem [shape: f32[64,8], index: 5, kind: input, shape index: {}]   ;;  %s1618_s6 = inlined_call_operand.vmem [shape: f32[8,8], index: 6, kind: input, shape index: {}]   ;;  %s1619_s7 = inlined_call_operand.hbm [shape: f32[128,128], index: 7, kind: input, shape index: {}]   ;;  %s1620_s8 = inlined_call_operand.vmem [shape: f32[1,128], index: 8, kind: input, shape index: {}]   ;;  %s1621_s9 = inlined_call_operand.hbm [shape: f32[128,128], index: 9, kind: input, shape index: {}]   ;;  %s1622_s10 = inlined_call_operand.vmem [shape: f32[1,128], index: 10, kind: input, shape index: {}]   ;;  %s1623_s11 = inlined_call_operand.hbm [shape: f32[256,512], index: 11, kind: input, shape index: {}]   ;;  %s1624_s12 = inlined_call_operand.vmem [shape: f32[1,512], index: 12, kind: input, shape index: {}]   ;;  %s1625_s13 = inlined_call_operand.hbm [shape: f32[256,256], index: 13, kind: input, shape index: {}]   ;;  %s1626_s14 = inlined_call_operand.vmem [shape: f32[1,256], index: 14, kind: input, shape index: {}]   ;;  %s1627_s15 = inlined_call_operand.hbm [shape: f32[512,128], index: 15, kind: input, shape index: {}]   ;;  %s1628_s16 = inlined_call_operand.hbm [shape: f32[256,128], index: 16, kind: input, shape index: {}]   ;;  %s1629_s17 = inlined_call_operand.vmem [shape: f32[1,128], index: 17, kind: input, shape index: {}]   ;;  %s1630_s18 = inlined_call_operand.vmem [shape: f32[8,128], index: 18, kind: output, shape index: {0}]   ;;  %s1631_s19 = inlined_call_operand.hbm [shape: f32[8,128], index: 19, kind: output, shape index: {1}]   ;;  %s1632_s20 = inlined_call_operand.hbm [shape: f32[64,128], index: 20, kind: output, shape index: {2}]  }
   0x1   :  { %1633 = sst [smem:[#allocation22_spill]] %s1612_s0 }
   0x2   :  { %1634 = sst [smem:[#allocation23_spill]] %s1613_s1 }
   0x3   :  { %1635 = sst [smem:[#allocation24_spill]] %s1614_s2 }
   0x4   :  { %1636 = sst [smem:[#allocation25_spill]] %s1615_s3 }
   0x5   :  { %1637 = sst [smem:[#allocation26_spill]] %s1616_s4 }
   0x6   :  { %26 = vsyncpa [#allocation3], 0 }
   0x7   :  { %27 = vsyncpa [#allocation6], 0 }
   0x8   :  { %28 = vsyncpa [#allocation9], 0 }
   0x9   :  { %29 = vsyncpa [#allocation12], 0 }
   0xa   :  { %30 = vsyncpa [#allocation4], 0 }
   0xb   :  { %31 = vsyncpa [#allocation15], 0  ;;  %s65_s23 = sshll.u32 %s1621_s9, 4  ;;  %s1376_s24 = smov [#allocation5]   ;;  %s66_s23 = int_to_ptr.hbm [resolvable:$true] %s65_s23 }
   0xc   :  { %s67_s2 = sshll.u32 %s1376_s24, 4  ;;  %s95_s26 = sshll.u32 %s1625_s13, 4  ;;  %s68_s2 = int_to_ptr.vmem [resolvable:$true] %s67_s2  ;;  %s96_s26 = int_to_ptr.hbm [resolvable:$true] %s95_s26 }
   0xd   :  { %s1377_s27 = smov 128   ;;  %s1378_s28 = smov 8  }
   0xe   :  { %73 = dma.hbm_to_vmem [thread:$0]  %s66_s23, 2048, %s68_s2, [#allocation6], %s1377_s27, %s1377_s27, %s1378_s28  }
   0xf   :  { %s1379_s4 = smov [#allocation8]   ;;  %s1380_s30 = smov 256  }
  0x10   :  { %s97_s29 = sshll.u32 %s1379_s4, 4  ;;  %s1381_s9 = smov 16   ;;  %s98_s29 = int_to_ptr.vmem [resolvable:$true] %s97_s29 }
  0x11   :  { %103 = dma.hbm_to_vmem [thread:$0]  %s96_s26, 8192, %s98_s29, [#allocation9], %s1380_s30, %s1380_s30, %s1381_s9  }
  0x12   :  { %s50_s1 = sshll.u32 %s1619_s7, 4  ;;  %s1382_s22 = smov [#allocation2]   ;;  %s51_s1 = int_to_ptr.hbm [resolvable:$true] %s50_s1 }
  0x13   :  { %s52_s13 = sshll.u32 %s1382_s22, 4  ;;  %s80_s3 = sshll.u32 %s1623_s11, 4  ;;  %s53_s13 = int_to_ptr.vmem [resolvable:$true] %s52_s13  ;;  %s81_s3 = int_to_ptr.hbm [resolvable:$true] %s80_s3 }
  0x14   :  { %58 = dma.hbm_to_vmem [thread:$0]  %s51_s1, 2048, %s53_s13, [#allocation3], %s1377_s27, %s1377_s27, %s1378_s28  }
  0x15   :  { %s1383_s23 = smov [#allocation7]   ;;  %s1384_s26 = smov 512  }
  0x16   :  { %s82_s2 = sshll.u32 %s1383_s23, 4  ;;  %s1385_s4 = smov 32   ;;  %s83_s2 = int_to_ptr.vmem [resolvable:$true] %s82_s2 }
  0x17   :  { %88 = dma.hbm_to_vmem [thread:$0]  %s81_s3, 16384, %s83_s2, [#allocation6], %s1384_s26, %s1384_s26, %s1385_s4  }
  0x18   :  { %s110_s30 = sshll.u32 %s1627_s15, 4  ;;  %s1386_s9 = smov [#allocation10]   ;;  %s111_s30 = int_to_ptr.hbm [resolvable:$true] %s110_s30 }
  0x19   :  { %s112_s0 = sshll.u32 %s1386_s9, 4  ;;  %s123_s22 = sshll.u32 %s1628_s16, 4  ;;  %s113_s0 = int_to_ptr.vmem [resolvable:$true] %s112_s0  ;;  %s124_s22 = int_to_ptr.hbm [resolvable:$true] %s123_s22 }
  0x1a   :  { %118 = dma.hbm_to_vmem [thread:$0]  %s111_s30, 8192, %s113_s0, [#allocation9], %s1377_s27, %s1377_s27, %s1378_s28  }
  0x1b   :  { %s1387_s1 = smov [#allocation11]  }
  0x1c   :  { %s125_s13 = sshll.u32 %s1387_s1, 4  ;;  %s126_s13 = int_to_ptr.vmem [resolvable:$true] %s125_s13 }
  0x1d   :  { %131 = dma.hbm_to_vmem [thread:$0]  %s124_s22, 4096, %s126_s13, [#allocation12], %s1377_s27, %s1377_s27, %s1378_s28  }
  0x1e   :  { %1364 = dma.done.wait [#allocation3], 2048  }
  0x1f   :  { %1365 = vsyncadd [#allocation3], 4294965248 }
  0x20   :  { %1366 = dma.done.wait [#allocation6], 18432  }
  0x21   :  { %1367 = vsyncadd [#allocation6], 4294948864 }
  0x22   :  { %1368 = dma.done.wait [#allocation9], 16384  }
  0x23   :  { %1369 = vsyncadd [#allocation9], 4294950912 }
  0x24   :  { %1370 = dma.done.wait [#allocation12], 4096  }
  0x25   :  { %1371 = vsyncadd [#allocation12], 4294963200  ;;  %v214_v0 = vld [vmem:[#allocation5 + $0x78] sm:$0xff]  ;;  %v213_v1 = vld [vmem:[#allocation5 + $0x70] sm:$0xff]  ;;  %s1638_s24 = sld [smem:[#allocation23_spill]]  ;;  %vm241_vm0 = vcmask 64512  }
  0x26   :  { %219 = vmatpush.msra.mxu1 %v214_v0  ;;  %v212_v2 = vld [vmem:[#allocation5 + $0x68] sm:$0xff]  ;;  %v211_v3 = vld [vmem:[#allocation5 + $0x60] sm:$0xff]  ;;  %v174_v4 = vld [vmem:[#allocation2 + $0x78] sm:$0xff]  ;;  %s1639_s23 = sld [smem:[#allocation22_spill]]  ;;  %s1110_s1 = sshll.u32 %s1631_s19, 4  ;;  %s1111_s1 = int_to_ptr.hbm [resolvable:$true] %s1110_s1 }
  0x27   :  { %v173_v5 = vld [vmem:[#allocation2 + $0x70] sm:$0xff]  ;;  %179 = vmatpush.msra.mxu0 %v174_v4  ;;  %v210_v6 = vld [vmem:[#allocation5 + $0x58] sm:$0xff]  ;;  %v172_v7 = vld [vmem:[#allocation2 + $0x68] sm:$0xff]  ;;  %s1640_s4 = sld [smem:[#allocation24_spill]]  ;;  %s1389_s13 = smov [#allocation14]  }
  0x28   :  { %220 = vmatpush.msra.mxu1 %v213_v1  ;;  %v209_v8 = vld [vmem:[#allocation5 + $0x50] sm:$0xff]  ;;  %v171_v9 = vld [vmem:[#allocation2 + $0x60] sm:$0xff]  ;;  %v208_v10 = vld [vmem:[#allocation5 + $0x48] sm:$0xff]  ;;  %s1641_s22 = sld [smem:[#allocation25_spill]]  ;;  %s1118_s15 = sshll.u32 %s1389_s13, 4  ;;  %s1119_s15 = int_to_ptr.vmem [resolvable:$true] %s1118_s15 }
  0x29   :  { %180 = vmatpush.msra.mxu0 %v173_v5  ;;  %v170_v11 = vld [vmem:[#allocation2 + $0x58] sm:$0xff]  ;;  %v207_v12 = vld [vmem:[#allocation5 + $0x40] sm:$0xff]  ;;  %v169_v13 = vld [vmem:[#allocation2 + $0x50] sm:$0xff]  ;;  %s1120_s25 = sshll.u32 %s1632_s20, 4  ;;  %s1121_s25 = int_to_ptr.hbm [resolvable:$true] %s1120_s25 }
  0x2a   :  { %221 = vmatpush.msra.mxu1 %v212_v2  ;;  %v206_v14 = vld [vmem:[#allocation5 + $0x38] sm:$0xff]  ;;  %v168_v15 = vld [vmem:[#allocation2 + $0x48] sm:$0xff]  ;;  %v205_v16 = vld [vmem:[#allocation5 + $0x30] sm:$0xff] }
  0x2b   :  { %181 = vmatpush.msra.mxu0 %v172_v7  ;;  %v167_v17 = vld [vmem:[#allocation2 + $0x40] sm:$0xff]  ;;  %v204_v18 = vld [vmem:[#allocation5 + $0x28] sm:$0xff]  ;;  %v166_v19 = vld [vmem:[#allocation2 + $0x38] sm:$0xff] }
  0x2c   :  { %222 = vmatpush.msra.mxu1 %v211_v3  ;;  %v203_v20 = vld [vmem:[#allocation5 + $0x20] sm:$0xff]  ;;  %v165_v21 = vld [vmem:[#allocation2 + $0x30] sm:$0xff]  ;;  %v202_v22 = vld [vmem:[#allocation5 + $0x18] sm:$0xff] }
  0x2d   :  { %182 = vmatpush.msra.mxu0 %v171_v9  ;;  %v164_v23 = vld [vmem:[#allocation2 + $0x28] sm:$0xff]  ;;  %v201_v24 = vld [vmem:[#allocation5 + $0x10] sm:$0xff]  ;;  %v163_v25 = vld [vmem:[#allocation2 + $0x20] sm:$0xff] }
  0x2e   :  { %223 = vmatpush.msra.mxu1 %v210_v6  ;;  %v200_v26 = vld [vmem:[#allocation5 + $0x8] sm:$0xff]  ;;  %v162_v27 = vld [vmem:[#allocation2 + $0x18] sm:$0xff]  ;;  %v199_v28 = vld [vmem:[#allocation5] sm:$0xff] }
  0x2f   :  { %183 = vmatpush.msra.mxu0 %v170_v11  ;;  %v161_v29 = vld [vmem:[#allocation2 + $0x10] sm:$0xff]  ;;  %v158_v30 = vld [vmem:[%s1638_s24] sm:$0xff]  ;;  %v160_v31 = vld [vmem:[#allocation2 + $0x8] sm:$0xff]  ;;  %s1642_s24 = sld [smem:[#allocation26_spill]] }
  0x30   :  { %224 = vmatpush.msra.mxu1 %v209_v8  ;;  %v159_v32 = vld [vmem:[#allocation2] sm:$0xff]  ;;  %v544_v35 = vld [vmem:[#allocation7 + $0x3e8] sm:$0xff]  ;;  %v545_v36 = vld [vmem:[#allocation7 + $0x3f0] sm:$0xff] }
  0x31   :  { %184 = vmatpush.msra.mxu0 %v169_v13  ;;  %v240_v33 = vld [vmem:[%s1639_s23] sm:$0xff]  ;;  %v540_v37 = vld [vmem:[#allocation7 + $0x3c8] sm:$0xff]  ;;  %v541_v38 = vld [vmem:[#allocation7 + $0x3d0] sm:$0xff] }
  0x32   :  { %225 = vmatpush.msra.mxu1 %v208_v10  ;;  %v239_v34 = vld [vmem:[%s1640_s4] sm:$0xff]  ;;  %260 = vmatpush.msra.mxu2 %v240_v33  ;;  %v536_v39 = vld [vmem:[#allocation7 + $0x3a8] sm:$0xff]  ;;  %v537_v40 = vld [vmem:[#allocation7 + $0x3b0] sm:$0xff] }
  0x33   :  { %185 = vmatpush.msra.mxu0 %v168_v15  ;;  %1143 = vmatmul.msk.f32.vlgmr.msra.gmra.mxu2 %vm241_vm0, %v239_v34  ;;  %v532_v41 = vld [vmem:[#allocation7 + $0x388] sm:$0xff]  ;;  %v533_v42 = vld [vmem:[#allocation7 + $0x390] sm:$0xff]  ;;  %v1169_v46 = vld [vmem:[%s1622_s10] ss:$0 sm:$0xff] }
  0x34   :  { %226 = vmatpush.msra.mxu1 %v207_v12  ;;  %v528_v43 = vld [vmem:[#allocation7 + $0x368] sm:$0xff]  ;;  %v529_v44 = vld [vmem:[#allocation7 + $0x370] sm:$0xff]  ;;  %v265_v53 = vld [vmem:[%s1618_s6] sm:$0xff] }
  0x35   :  { %186 = vmatpush.msra.mxu0 %v167_v17  ;;  %v524_v45 = vld [vmem:[#allocation7 + $0x348] sm:$0xff]  ;;  %v525_v47 = vld [vmem:[#allocation7 + $0x350] sm:$0xff]  ;;  %v1170_v54 = vld [vmem:[%s1620_s8] ss:$0 sm:$0xff] }
  0x36   :  { %227 = vmatpush.msra.mxu1 %v206_v14  ;;  %v520_v48 = vld [vmem:[#allocation7 + $0x328] sm:$0xff]  ;;  %v521_v49 = vld [vmem:[#allocation7 + $0x330] sm:$0xff]  ;;  %v290_v60 = vld [vmem:[%s1617_s5] sm:$0xff] }
  0x37   :  { %187 = vmatpush.msra.mxu0 %v166_v19  ;;  %v516_v51 = vld [vmem:[#allocation7 + $0x308] sm:$0xff]  ;;  %v517_v55 = vld [vmem:[#allocation7 + $0x310] sm:$0xff]  ;;  %v546_v62 = vld [vmem:[#allocation7 + $0x3f8] sm:$0xff] }
  0x38   :  { %228 = vmatpush.msra.mxu1 %v205_v16  ;;  %v512_v56 = vld [vmem:[#allocation7 + $0x2e8] sm:$0xff]  ;;  %v513_v57 = vld [vmem:[#allocation7 + $0x2f0] sm:$0xff]  ;;  %v542_v1 = vld [vmem:[#allocation7 + $0x3d8] sm:$0xff] }
  0x39   :  { %188 = vmatpush.msra.mxu0 %v165_v21  ;;  %v508_v61 = vld [vmem:[#allocation7 + $0x2c8] sm:$0xff]  ;;  %v509_v63 = vld [vmem:[#allocation7 + $0x2d0] sm:$0xff]  ;;  %v371_v3 = vld [vmem:[%s1641_s22] sm:$0xff] }
  0x3a   :  { %229 = vmatpush.msra.mxu1 %v204_v18  ;;  %v504_v0 = vld [vmem:[#allocation7 + $0x2a8] sm:$0xff]  ;;  %v505_v2 = vld [vmem:[#allocation7 + $0x2b0] sm:$0xff]  ;;  %v543_v5 = vld [vmem:[#allocation7 + $0x3e0] sm:$0xff] }
  0x3b   :  { %189 = vmatpush.msra.mxu0 %v164_v23  ;;  %v500_v4 = vld [vmem:[#allocation7 + $0x288] sm:$0xff]  ;;  %v538_v6 = vld [vmem:[#allocation7 + $0x3b8] sm:$0xff]  ;;  %v501_v7 = vld [vmem:[#allocation7 + $0x290] sm:$0xff] }
  0x3c   :  { %230 = vmatpush.msra.mxu1 %v203_v20  ;;  %v496_v8 = vld [vmem:[#allocation7 + $0x268] sm:$0xff]  ;;  %v539_v9 = vld [vmem:[#allocation7 + $0x3c0] sm:$0xff]  ;;  %v534_v10 = vld [vmem:[#allocation7 + $0x398] sm:$0xff] }
  0x3d   :  { %190 = vmatpush.msra.mxu0 %v163_v25  ;;  %v291_v11 = vld [vmem:[%s1617_s5 + $0x8] sm:$0xff]  ;;  %v497_v12 = vld [vmem:[#allocation7 + $0x270] sm:$0xff]  ;;  %v535_v13 = vld [vmem:[#allocation7 + $0x3a0] sm:$0xff] }
  0x3e   :  { %231 = vmatpush.msra.mxu1 %v202_v22  ;;  %v530_v14 = vld [vmem:[#allocation7 + $0x378] sm:$0xff]  ;;  %v492_v15 = vld [vmem:[#allocation7 + $0x248] sm:$0xff]  ;;  %v493_v16 = vld [vmem:[#allocation7 + $0x250] sm:$0xff] }
  0x3f   :  { %191 = vmatpush.msra.mxu0 %v162_v27  ;;  %v531_v17 = vld [vmem:[#allocation7 + $0x380] sm:$0xff]  ;;  %v526_v18 = vld [vmem:[#allocation7 + $0x358] sm:$0xff]  ;;  %v488_v20 = vld [vmem:[#allocation7 + $0x228] sm:$0xff] }
  0x40   :  { %232 = vmatpush.msra.mxu1 %v201_v24  ;;  %v395_v19 = vld [vmem:[%s1642_s24] sm:$0xff]  ;;  %v522_v22 = vld [vmem:[#allocation7 + $0x338] sm:$0xff]  ;;  %v489_v23 = vld [vmem:[#allocation7 + $0x230] sm:$0xff] }
  0x41   :  { %192 = vmatpush.msra.mxu0 %v161_v29  ;;  %v527_v21 = vld [vmem:[#allocation7 + $0x360] sm:$0xff]  ;;  %v484_v24 = vld [vmem:[#allocation7 + $0x208] sm:$0xff]  ;;  %v292_v27 = vld [vmem:[%s1617_s5 + $0x10] sm:$0xff] }
  0x42   :  { %233 = vmatpush.msra.mxu1 %v200_v26  ;;  %v523_v25 = vld [vmem:[#allocation7 + $0x340] sm:$0xff]  ;;  %v518_v26 = vld [vmem:[#allocation7 + $0x318] sm:$0xff] }
  0x43   :  { %193 = vmatpush.msra.mxu0 %v160_v31  ;;  %v519_v29 = vld [vmem:[#allocation7 + $0x320] sm:$0xff]  ;;  %v480_v31 = vld [vmem:[#allocation7 + $0x1e8] sm:$0xff]  ;;  %v510_v34 = vld [vmem:[#allocation7 + $0x2d8] sm:$0xff] }
  0x44   :  { %234 = vmatpush.msra.mxu1 %v199_v28  ;;  %v485_v28 = vld [vmem:[#allocation7 + $0x210] sm:$0xff]  ;;  %v515_v33 = vld [vmem:[#allocation7 + $0x300] sm:$0xff] }
  0x45   :  { %235 = vmatmul.f32.vlgmr.msra.gmra.mxu1 %v158_v30  ;;  %194 = vmatpush.msra.mxu0 %v159_v32  ;;  %v481_v32 = vld [vmem:[#allocation7 + $0x1f0] sm:$0xff] }
  0x46   :  { %195 = vmatmul.f32.vlgmr.msra.gmra.mxu0 %v158_v30  ;;  %587 = vmatpush.msrb.mxu1 %v545_v36  ;;  %v477_v36 = vld [vmem:[#allocation7 + $0x1d0] sm:$0xff] }
  0x47   :  { %567 = vmatpush.msrb.mxu0 %v544_v35  ;;  %v476_v35 = vld [vmem:[#allocation7 + $0x1c8] sm:$0xff] }
  0x48   :  { %588 = vmatpush.msrb.mxu1 %v541_v38  ;;  %v506_v38 = vld [vmem:[#allocation7 + $0x2b8] sm:$0xff] }
  0x49   :  { %568 = vmatpush.msrb.mxu0 %v540_v37  ;;  %v511_v37 = vld [vmem:[#allocation7 + $0x2e0] sm:$0xff] }
  0x4a   :  { %589 = vmatpush.msrb.mxu1 %v537_v40  ;;  %v473_v40 = vld [vmem:[#allocation7 + $0x1b0] sm:$0xff] }
  0x4b   :  { %569 = vmatpush.msrb.mxu0 %v536_v39  ;;  %v472_v39 = vld [vmem:[#allocation7 + $0x1a8] sm:$0xff] }
  0x4c   :  { %590 = vmatpush.msrb.mxu1 %v533_v42  ;;  %v502_v42 = vld [vmem:[#allocation7 + $0x298] sm:$0xff] }
  0x4d   :  { %570 = vmatpush.msrb.mxu0 %v532_v41  ;;  %v507_v41 = vld [vmem:[#allocation7 + $0x2c0] sm:$0xff] }
  0x4e   :  { %591 = vmatpush.msrb.mxu1 %v529_v44  ;;  %v468_v44 = vld [vmem:[#allocation7 + $0x188] sm:$0xff] }
  0x4f   :  { %571 = vmatpush.msrb.mxu0 %v528_v43  ;;  %v293_v43 = vld [vmem:[%s1617_s5 + $0x18] sm:$0xff] }
  0x50   :  { %592 = vmatpush.msrb.mxu1 %v525_v47  ;;  %v469_v47 = vld [vmem:[#allocation7 + $0x190] sm:$0xff] }
  0x51   :  { %572 = vmatpush.msrb.mxu0 %v524_v45  ;;  %v503_v45 = vld [vmem:[#allocation7 + $0x2a0] sm:$0xff] }
  0x52   :  { %593 = vmatpush.msrb.mxu1 %v521_v49  ;;  %v499_v49 = vld [vmem:[#allocation7 + $0x280] sm:$0xff] }
  0x53   :  { %573 = vmatpush.msrb.mxu0 %v520_v48  ;;  %v464_v48 = vld [vmem:[#allocation7 + $0x168] sm:$0xff] }
  0x54   :  { %594 = vmatpush.msrb.mxu1 %v517_v55  ;;  %v461_v55 = vld [vmem:[#allocation7 + $0x150] sm:$0xff] }
  0x55   :  { %574 = vmatpush.msrb.mxu0 %v516_v51  ;;  %v465_v51 = vld [vmem:[#allocation7 + $0x170] sm:$0xff] }
  0x56   :  { %595 = vmatpush.msrb.mxu1 %v513_v57  ;;  %v491_v57 = vld [vmem:[#allocation7 + $0x240] sm:$0xff] }
  0x57   :  { %575 = vmatpush.msrb.mxu0 %v512_v56  ;;  %v456_v56 = vld [vmem:[#allocation7 + $0x128] sm:$0xff] }
  0x58   :  { %596 = vmatpush.msrb.mxu1 %v509_v63  ;;  %v452_v63 = vld [vmem:[#allocation7 + $0x108] sm:$0xff] }
  0x59   :  { %576 = vmatpush.msrb.mxu0 %v508_v61  ;;  %v487_v61 = vld [vmem:[#allocation7 + $0x220] sm:$0xff] }
  0x5a   :  { %597 = vmatpush.msrb.mxu1 %v505_v2  ;;  %v478_v2 = vld [vmem:[#allocation7 + $0x1d8] sm:$0xff] }
  0x5b   :  { %577 = vmatpush.msrb.mxu0 %v504_v0  ;;  %v453_v0 = vld [vmem:[#allocation7 + $0x110] sm:$0xff] }
  0x5c   :  { %598 = vmatpush.msrb.mxu1 %v501_v7  ;;  %v475_v7 = vld [vmem:[#allocation7 + $0x1c0] sm:$0xff] }
  0x5d   :  { %578 = vmatpush.msrb.mxu0 %v500_v4  ;;  %v448_v4 = vld [vmem:[#allocation7 + $0xe8] sm:$0xff] }
  0x5e   :  { %599 = vmatpush.msrb.mxu1 %v497_v12  ;;  %v295_v12 = vld [vmem:[%s1617_s5 + $0x28] sm:$0xff] }
  0x5f   :  { %579 = vmatpush.msrb.mxu0 %v496_v8  ;;  %v444_v8 = vld [vmem:[#allocation7 + $0xc8] sm:$0xff] }
  0x60   :  { %600 = vmatpush.msrb.mxu1 %v493_v16  ;;  %v441_v16 = vld [vmem:[#allocation7 + $0xb0] sm:$0xff] }
  0x61   :  { %580 = vmatpush.msrb.mxu0 %v492_v15  ;;  %v467_v15 = vld [vmem:[#allocation7 + $0x180] sm:$0xff] }
  0x62   :  { %601 = vmatpush.msrb.mxu1 %v489_v23  ;;  %v459_v23 = vld [vmem:[#allocation7 + $0x140] sm:$0xff] }
  0x63   :  { %581 = vmatpush.msrb.mxu0 %v488_v20  ;;  %v437_v20 = vld [vmem:[#allocation7 + $0x90] sm:$0xff] }
  0x64   :  { %602 = vmatpush.msrb.mxu1 %v485_v28  ;;  %v296_v28 = vld [vmem:[%s1617_s5 + $0x30] sm:$0xff] }
  0x65   :  { %582 = vmatpush.msrb.mxu0 %v484_v24  ;;  %v433_v24 = vld [vmem:[#allocation7 + $0x70] sm:$0xff] }
  0x66   :  { %667 = vmatpush.msra.mxu1 %v481_v32  ;;  %v424_v32 = vld [vmem:[#allocation7 + $0x28] sm:$0xff] }
  0x67   :  { %647 = vmatpush.msra.mxu0 %v480_v31  ;;  %v451_v31 = vld [vmem:[#allocation7 + $0x100] sm:$0xff] }
  0x68   :  { %668 = vmatpush.msra.mxu1 %v477_v36  ;;  %v442_v36 = vld [vmem:[#allocation7 + $0xb8] sm:$0xff] }
  0x69   :  { %648 = vmatpush.msra.mxu0 %v476_v35  ;;  %v447_v35 = vld [vmem:[#allocation7 + $0xe0] sm:$0xff] }
  0x6a   :  { %669 = vmatpush.msra.mxu1 %v473_v40  ;;  %v297_v40 = vld [vmem:[%s1617_s5 + $0x38] sm:$0xff] }
  0x6b   :  { %649 = vmatpush.msra.mxu0 %v472_v39  ;;  %v439_v39 = vld [vmem:[#allocation7 + $0xa0] sm:$0xff] }
  0x6c   :  { %670 = vmatpush.msra.mxu1 %v469_v47  ;;  %v423_v47 = vld [vmem:[#allocation7 + $0x20] sm:$0xff] }
  0x6d   :  { %650 = vmatpush.msra.mxu0 %v468_v44  ;;  %v431_v44 = vld [vmem:[#allocation7 + $0x60] sm:$0xff] }
  0x6e   :  { %671 = vmatpush.msra.mxu1 %v465_v51  ;;  %v422_v51 = vld [vmem:[#allocation7 + $0x18] sm:$0xff] }
  0x6f   :  { %651 = vmatpush.msra.mxu0 %v464_v48  ;;  %v419_v48 = vld [vmem:[#allocation7] sm:$0xff] }
  0x70   :  { %672 = vmatpush.msra.mxu1 %v461_v55  ;;  %v788_v55 = vld [vmem:[#allocation8 + $0x1f8] sm:$0xff] }
  0xc2   :  { %v236_v50 = vpop.f32.mrf.mxu1 }
  0xc3   :  { %v237_v52 = vadd.f32 %v1169_v46, %v236_v50  ;;  %v196_v58 = vpop.f32.mrf.mxu0  ;;  %v498_v46 = vld [vmem:[#allocation7 + $0x278] sm:$0xff] }
  0xc4   :  { %v197_v59 = vadd.f32 %v1170_v54, %v196_v58  ;;  %v494_v50 = vld [vmem:[#allocation7 + $0x258] sm:$0xff] }
  0xc5   :  { %284 = vmatpush.msra.mxu3 %v237_v52  ;;  %v460_v52 = vld [vmem:[#allocation7 + $0x148] sm:$0xff]  ;;  %v490_v54 = vld [vmem:[#allocation7 + $0x238] sm:$0xff] }
  0xc6   :  { %1144 = vmatmul.msk.f32.vlgmr.msra.gmra.mxu3 %vm241_vm0, %v265_v53  ;;  %337 = vmatpush.msrb.mxu2 %v197_v59  ;;  %v495_v53 = vld [vmem:[#allocation7 + $0x260] sm:$0xff]  ;;  %v486_v58 = vld [vmem:[#allocation7 + $0x218] sm:$0xff] }
  0xc7   :  { %390 = vmatpush.msrb.mxu3 %v158_v30  ;;  %1145 = vmatmul.msk.f32.vlgmr.msrb.gmra.mxu2 %vm241_vm0, %v290_v60  ;;  %v514_v30 = vld [vmem:[#allocation7 + $0x2f8] sm:$0xff]  ;;  %v457_v60 = vld [vmem:[#allocation7 + $0x130] sm:$0xff] }
  0xc8   :  { %607 = vmatpush.msra.mxu2 %v546_v62  ;;  %652 = vmatpush.msra.mxu0 %v460_v52  ;;  %v482_v62 = vld [vmem:[#allocation7 + $0x1f8] sm:$0xff]  ;;  %v262_v52 = vpop.f32.mrf.mxu2 }
  0xc9   :  { %414 = vmatpush.msra.mxu3 %v197_v59  ;;  %v294_v59 = vld [vmem:[%s1617_s5 + $0x20] sm:$0xff]  ;;  %673 = vmatpush.msra.mxu1 %v457_v60 }
  0xca   :  { %608 = vmatpush.msra.mxu2 %v542_v1  ;;  %653 = vmatpush.msra.mxu0 %v456_v56  ;;  %v483_v1 = vld [vmem:[#allocation7 + $0x200] sm:$0xff]  ;;  %v755_v56 = vld [vmem:[#allocation8 + $0xf0] sm:$0xff] }
  0xcb   :  { %674 = vmatpush.msra.mxu1 %v453_v0  ;;  %v753_v60 = vld [vmem:[#allocation8 + $0xe0] sm:$0xff]  ;;  %v751_v0 = vld [vmem:[#allocation8 + $0xd0] sm:$0xff] }
  0xcc   :  { %609 = vmatpush.msra.mxu2 %v538_v6  ;;  %654 = vmatpush.msra.mxu0 %v452_v63  ;;  %v449_v6 = vld [vmem:[#allocation7 + $0xf0] sm:$0xff]  ;;  %v784_v63 = vld [vmem:[#allocation8 + $0x1d8] sm:$0xff] }
  0xcd   :  { %675 = vmatpush.msra.mxu1 %v449_v6  ;;  %v750_v6 = vld [vmem:[#allocation8 + $0xc8] sm:$0xff] }
  0xce   :  { %1153 = vmatmul.msk.f32.vlgmr.msrb.gmra.mxu3 %vm241_vm0, %v371_v3  ;;  %610 = vmatpush.msra.mxu2 %v534_v10  ;;  %v479_v3 = vld [vmem:[#allocation7 + $0x1e0] sm:$0xff]  ;;  %v445_v10 = vld [vmem:[#allocation7 + $0xd0] sm:$0xff] }
  0xcf   :  { %547 = vmatpush.msrb.mxu3 %v543_v5  ;;  %1146 = vmatmul.msk.f32.gmra.mxu2 %vm241_vm0, %v291_v11  ;;  %v474_v5 = vld [vmem:[#allocation7 + $0x1b8] sm:$0xff]  ;;  %v471_v11 = vld [vmem:[#allocation7 + $0x1a0] sm:$0xff] }
  0xd0   :  { %611 = vmatpush.msra.mxu2 %v530_v14  ;;  %655 = vmatpush.msra.mxu0 %v448_v4  ;;  %v440_v14 = vld [vmem:[#allocation7 + $0xa8] sm:$0xff] }
  0xd1   :  { %548 = vmatpush.msrb.mxu3 %v539_v9  ;;  %v470_v9 = vld [vmem:[#allocation7 + $0x198] sm:$0xff]  ;;  %676 = vmatpush.msra.mxu1 %v445_v10 }
  0xd2   :  { %612 = vmatpush.msra.mxu2 %v526_v18  ;;  %656 = vmatpush.msra.mxu0 %v444_v8  ;;  %v436_v18 = vld [vmem:[#allocation7 + $0x88] sm:$0xff]  ;;  %v780_v8 = vld [vmem:[#allocation8 + $0x1b8] sm:$0xff] }
  0xd3   :  { %549 = vmatpush.msrb.mxu3 %v535_v13  ;;  %v466_v13 = vld [vmem:[#allocation7 + $0x178] sm:$0xff]  ;;  %677 = vmatpush.msra.mxu1 %v441_v16 }
  0xd4   :  { %613 = vmatpush.msra.mxu2 %v522_v22  ;;  %657 = vmatpush.msra.mxu0 %v440_v14  ;;  %v432_v22 = vld [vmem:[#allocation7 + $0x68] sm:$0xff]  ;;  %v748_v10 = vld [vmem:[#allocation8 + $0xb8] sm:$0xff] }
  0xd5   :  { %550 = vmatpush.msrb.mxu3 %v531_v17  ;;  %v462_v17 = vld [vmem:[#allocation7 + $0x158] sm:$0xff]  ;;  %678 = vmatpush.msra.mxu1 %v437_v20  ;;  %v746_v14 = vld [vmem:[#allocation8 + $0xa8] sm:$0xff]  ;;  %v773_v20 = vld [vmem:[#allocation8 + $0x180] sm:$0xff] }
  0xd6   :  { %1154 = vmatmul.msk.f32.vlgmr.msra.gmra.mxu3 %vm241_vm0, %v395_v19  ;;  %614 = vmatpush.msra.mxu2 %v518_v26  ;;  %v463_v19 = vld [vmem:[#allocation7 + $0x160] sm:$0xff]  ;;  %v428_v26 = vld [vmem:[#allocation7 + $0x48] sm:$0xff]  ;;  %v776_v16 = vld [vmem:[#allocation8 + $0x198] sm:$0xff] }
  0xd7   :  { %551 = vmatpush.msrb.mxu3 %v527_v21  ;;  %1147 = vmatmul.msk.f32.gmra.mxu2 %vm241_vm0, %v292_v27  ;;  %v458_v21 = vld [vmem:[#allocation7 + $0x138] sm:$0xff]  ;;  %v455_v27 = vld [vmem:[#allocation7 + $0x120] sm:$0xff] }
  0xd8   :  { %615 = vmatpush.msra.mxu2 %v514_v30  ;;  %658 = vmatpush.msra.mxu0 %v436_v18  ;;  %v429_v30 = vld [vmem:[#allocation7 + $0x50] sm:$0xff] }
  0xd9   :  { %552 = vmatpush.msrb.mxu3 %v523_v25  ;;  %v454_v25 = vld [vmem:[#allocation7 + $0x118] sm:$0xff]  ;;  %679 = vmatpush.msra.mxu1 %v433_v24  ;;  %v743_v18 = vld [vmem:[#allocation8 + $0x90] sm:$0xff] }
  0xda   :  { %616 = vmatpush.msra.mxu2 %v510_v34  ;;  %659 = vmatpush.msra.mxu0 %v432_v22  ;;  %v425_v34 = vld [vmem:[#allocation7 + $0x30] sm:$0xff]  ;;  %v741_v22 = vld [vmem:[#allocation8 + $0x80] sm:$0xff] }
  0xdb   :  { %553 = vmatpush.msrb.mxu3 %v519_v29  ;;  %v450_v29 = vld [vmem:[#allocation7 + $0xf8] sm:$0xff]  ;;  %680 = vmatpush.msra.mxu1 %v429_v30  ;;  %v771_v24 = vld [vmem:[#allocation8 + $0x170] sm:$0xff]  ;;  %v737_v30 = vld [vmem:[#allocation8 + $0x60] sm:$0xff] }
  0xdc   :  { %617 = vmatpush.msra.mxu2 %v506_v38  ;;  %660 = vmatpush.msra.mxu0 %v428_v26  ;;  %v438_v38 = vld [vmem:[#allocation7 + $0x98] sm:$0xff]  ;;  %v739_v26 = vld [vmem:[#allocation8 + $0x70] sm:$0xff] }
  0xdd   :  { %554 = vmatpush.msrb.mxu3 %v515_v33  ;;  %v446_v33 = vld [vmem:[#allocation7 + $0xd8] sm:$0xff]  ;;  %681 = vmatpush.msra.mxu1 %v425_v34 }
  0xde   :  { %618 = vmatpush.msra.mxu2 %v502_v42  ;;  %661 = vmatpush.msra.mxu0 %v424_v32  ;;  %v435_v42 = vld [vmem:[#allocation7 + $0x80] sm:$0xff]  ;;  %v767_v32 = vld [vmem:[#allocation8 + $0x150] sm:$0xff] }
  0xdf   :  { %555 = vmatpush.msrb.mxu3 %v511_v37  ;;  %1148 = vmatmul.msk.f32.gmra.mxu2 %vm241_vm0, %v293_v43  ;;  %v443_v37 = vld [vmem:[#allocation7 + $0xc0] sm:$0xff]  ;;  %v430_v43 = vld [vmem:[#allocation7 + $0x58] sm:$0xff] }
  0xe0   :  { %619 = vmatpush.msra.mxu2 %v498_v46  ;;  %v427_v46 = vld [vmem:[#allocation7 + $0x40] sm:$0xff] }
  0xe1   :  { %556 = vmatpush.msrb.mxu3 %v507_v41  ;;  %v434_v41 = vld [vmem:[#allocation7 + $0x78] sm:$0xff] }
  0xe2   :  { %620 = vmatpush.msra.mxu2 %v494_v50  ;;  %v421_v50 = vld [vmem:[#allocation7 + $0x10] sm:$0xff] }
  0xe3   :  { %557 = vmatpush.msrb.mxu3 %v503_v45  ;;  %v426_v45 = vld [vmem:[#allocation7 + $0x38] sm:$0xff]  ;;  %682 = vmatpush.msra.mxu1 %v421_v50  ;;  %v759_v50 = vld [vmem:[#allocation8 + $0x110] sm:$0xff] }
  0xe4   :  { %621 = vmatpush.msra.mxu2 %v490_v54  ;;  %v787_v54 = vld [vmem:[#allocation8 + $0x1f0] sm:$0xff] }
  0xe5   :  { %558 = vmatpush.msrb.mxu3 %v499_v49  ;;  %v420_v49 = vld [vmem:[#allocation7 + $0x8] sm:$0xff] }
  0xe6   :  { %622 = vmatpush.msra.mxu2 %v486_v58  ;;  %662 = vmatpush.msra.mxu0 %v420_v49  ;;  %v785_v58 = vld [vmem:[#allocation8 + $0x1e0] sm:$0xff]  ;;  %v730_v49 = vld [vmem:[#allocation8 + $0x28] sm:$0xff] }
  0xe7   :  { %559 = vmatpush.msrb.mxu3 %v495_v53  ;;  %1149 = vmatmul.msk.f32.gmra.mxu2 %vm241_vm0, %v294_v59  ;;  %v786_v59 = vld [vmem:[#allocation8 + $0x1e8] sm:$0xff] }
  0xe8   :  { %687 = vmatpush.msrb.mxu2 %v482_v62  ;;  %v783_v62 = vld [vmem:[#allocation8 + $0x1d0] sm:$0xff] }
  0xe9   :  { %560 = vmatpush.msrb.mxu3 %v491_v57  ;;  %v756_v57 = vld [vmem:[#allocation8 + $0xf8] sm:$0xff] }
  0xea   :  { %688 = vmatpush.msrb.mxu2 %v478_v2  ;;  %v781_v2 = vld [vmem:[#allocation8 + $0x1c0] sm:$0xff] }
  0xeb   :  { %561 = vmatpush.msrb.mxu3 %v487_v61  ;;  %v754_v61 = vld [vmem:[#allocation8 + $0xe8] sm:$0xff] }
  0xec   :  { %689 = vmatpush.msrb.mxu2 %v474_v5  ;;  %v749_v5 = vld [vmem:[#allocation8 + $0xc0] sm:$0xff] }
  0xed   :  { %562 = vmatpush.msrb.mxu3 %v483_v1  ;;  %v752_v1 = vld [vmem:[#allocation8 + $0xd8] sm:$0xff] }
  0xee   :  { %690 = vmatpush.msrb.mxu2 %v470_v9  ;;  %v747_v9 = vld [vmem:[#allocation8 + $0xb0] sm:$0xff] }
  0xef   :  { %627 = vmatpush.msra.mxu3 %v479_v3  ;;  %1150 = vmatmul.msk.f32.gmra.mxu2 %vm241_vm0, %v295_v12  ;;  %v782_v3 = vld [vmem:[#allocation8 + $0x1c8] sm:$0xff] }
  0xf0   :  { %691 = vmatpush.msrb.mxu2 %v466_v13  ;;  %v778_v12 = vld [vmem:[#allocation8 + $0x1a8] sm:$0xff]  ;;  %v745_v13 = vld [vmem:[#allocation8 + $0xa0] sm:$0xff] }
  0xf1   :  { %628 = vmatpush.msra.mxu3 %v475_v7  ;;  %v779_v7 = vld [vmem:[#allocation8 + $0x1b0] sm:$0xff] }
  0xf2   :  { %692 = vmatpush.msrb.mxu2 %v462_v17 }
  0xf3   :  { %629 = vmatpush.msra.mxu3 %v471_v11  ;;  %v777_v11 = vld [vmem:[#allocation8 + $0x1a0] sm:$0xff] }
  0xf4   :  { %693 = vmatpush.msrb.mxu2 %v458_v21  ;;  %v774_v21 = vld [vmem:[#allocation8 + $0x188] sm:$0xff] }
  0xf5   :  { %630 = vmatpush.msra.mxu3 %v467_v15  ;;  %v775_v15 = vld [vmem:[#allocation8 + $0x190] sm:$0xff] }
  0xf6   :  { %694 = vmatpush.msrb.mxu2 %v454_v25  ;;  %v772_v25 = vld [vmem:[#allocation8 + $0x178] sm:$0xff] }
  0xf7   :  { %631 = vmatpush.msra.mxu3 %v463_v19  ;;  %1151 = vmatmul.msk.f32.gmra.mxu2 %vm241_vm0, %v296_v28  ;;  %v744_v19 = vld [vmem:[#allocation8 + $0x98] sm:$0xff]  ;;  %v769_v28 = vld [vmem:[#allocation8 + $0x160] sm:$0xff] }
  0xf8   :  { %695 = vmatpush.msrb.mxu2 %v450_v29  ;;  %v770_v29 = vld [vmem:[#allocation8 + $0x168] sm:$0xff] }
  0xf9   :  { %632 = vmatpush.msra.mxu3 %v459_v23  ;;  %v742_v23 = vld [vmem:[#allocation8 + $0x88] sm:$0xff] }
  0xfa   :  { %696 = vmatpush.msrb.mxu2 %v446_v33  ;;  %v768_v33 = vld [vmem:[#allocation8 + $0x158] sm:$0xff] }
  0xfb   :  { %633 = vmatpush.msra.mxu3 %v455_v27  ;;  %v740_v27 = vld [vmem:[#allocation8 + $0x78] sm:$0xff] }
  0xfc   :  { %697 = vmatpush.msrb.mxu2 %v442_v36  ;;  %v736_v36 = vld [vmem:[#allocation8 + $0x58] sm:$0xff] }
  0xfd   :  { %634 = vmatpush.msra.mxu3 %v451_v31  ;;  %v738_v31 = vld [vmem:[#allocation8 + $0x68] sm:$0xff] }
  0xfe   :  { %698 = vmatpush.msrb.mxu2 %v438_v38  ;;  %v765_v38 = vld [vmem:[#allocation8 + $0x140] sm:$0xff] }
  0xff   :  { %635 = vmatpush.msra.mxu3 %v447_v35  ;;  %1152 = vmatmul.msk.f32.gmra.mxu2 %vm241_vm0, %v297_v40  ;;  %v735_v35 = vld [vmem:[#allocation8 + $0x50] sm:$0xff]  ;;  %v733_v40 = vld [vmem:[#allocation8 + $0x40] sm:$0xff] }
 0x100   :  { %699 = vmatpush.msrb.mxu2 %v434_v41  ;;  %v734_v41 = vld [vmem:[#allocation8 + $0x48] sm:$0xff] }
 0x101   :  { %636 = vmatpush.msra.mxu3 %v443_v37 }
 0x102   :  { %700 = vmatpush.msrb.mxu2 %v430_v43  ;;  %v764_v43 = vld [vmem:[#allocation8 + $0x138] sm:$0xff] }
 0x103   :  { %637 = vmatpush.msra.mxu3 %v439_v39  ;;  %v766_v39 = vld [vmem:[#allocation8 + $0x148] sm:$0xff] }
 0x104   :  { %701 = vmatpush.msrb.mxu2 %v426_v45  ;;  %v732_v45 = vld [vmem:[#allocation8 + $0x38] sm:$0xff] }
 0x105   :  { %638 = vmatpush.msra.mxu3 %v435_v42  ;;  %v763_v42 = vld [vmem:[#allocation8 + $0x130] sm:$0xff] }
 0x106   :  { %702 = vmatpush.msrb.mxu2 %v422_v51  ;;  %v760_v51 = vld [vmem:[#allocation8 + $0x118] sm:$0xff] }
 0x107   :  { %639 = vmatpush.msra.mxu3 %v431_v44  ;;  %v731_v44 = vld [vmem:[#allocation8 + $0x30] sm:$0xff] }
 0x109   :  { %640 = vmatpush.msra.mxu3 %v427_v46  ;;  %v761_v46 = vld [vmem:[#allocation8 + $0x120] sm:$0xff] }
 0x10b   :  { %641 = vmatpush.msra.mxu3 %v423_v47  ;;  %v762_v47 = vld [vmem:[#allocation8 + $0x128] sm:$0xff] }
 0x10d   :  { %642 = vmatpush.msra.mxu3 %v419_v48  ;;  %v729_v48 = vld [vmem:[#allocation8 + $0x20] sm:$0xff] }
 0x149   :  { %v286_v53 = vpop.f32.mrf.mxu3 }
 0x14a   :  { %289 = vst [vmem:[#allocation13] sm:$0xff] %v286_v53  ;;  %563 = vmatmul.f32.vlgmr.msrb.gmra.mxu3 %v286_v53  ;;  %583 = vmatmul.f32.vlgmr.msrb.gmra.mxu0 %v286_v53  ;;  %v339_v4 = vpop.f32.mrf.mxu2 }
 0x14b   :  { %603 = vmatmul.f32.vlgmr.msrb.gmra.mxu1 %v286_v53  ;;  %623 = vmatmul.f32.vlgmr.msra.gmra.mxu2 %v286_v53  ;;  %363 = vst [vmem:[#allocation14] sm:$0xff] %v339_v4  ;;  %v727_v53 = vld [vmem:[#allocation8 + $0x10] sm:$0xff] }
 0x14c   :  { %789 = vmatpush.msrb.mxu3 %v787_v54  ;;  %809 = vmatpush.msrb.mxu0 %v788_v55  ;;  %v728_v54 = vld [vmem:[#allocation8 + $0x18] sm:$0xff]  ;;  %v757_v55 = vld [vmem:[#allocation8 + $0x100] sm:$0xff]  ;;  %v893_v4 = vld [vmem:[#allocation10 + $0x70] sm:$0xff] }
 0x14d   :  { %829 = vmatpush.msrb.mxu1 %v755_v56  ;;  %849 = vmatpush.msra.mxu2 %v756_v57  ;;  %v758_v56 = vld [vmem:[#allocation8 + $0x108] sm:$0xff]  ;;  %v725_v57 = vld [vmem:[#allocation8] sm:$0xff] }
 0x14e   :  { %790 = vmatpush.msrb.mxu3 %v785_v58  ;;  %810 = vmatpush.msrb.mxu0 %v786_v59  ;;  %v726_v58 = vld [vmem:[#allocation8 + $0x8] sm:$0xff] }
 0x14f   :  { %830 = vmatpush.msrb.mxu1 %v753_v60  ;;  %850 = vmatpush.msra.mxu2 %v754_v61  ;;  %v910_v60 = vld [vmem:[#allocation10 + $0xf8] sm:$0xff] }
 0x150   :  { %791 = vmatpush.msrb.mxu3 %v783_v62  ;;  %811 = vmatpush.msrb.mxu0 %v784_v63  ;;  %v958_v61 = vld [vmem:[#allocation11 + $0x78] sm:$0xff] }
 0x151   :  { %831 = vmatpush.msrb.mxu1 %v751_v0  ;;  %851 = vmatpush.msra.mxu2 %v752_v1  ;;  %v392_v37 = vpop.f32.mrf.mxu3  ;;  %v974_v62 = vld [vmem:[#allocation11 + $0xf8] sm:$0xff]  ;;  %v909_v1 = vld [vmem:[#allocation10 + $0xf0] sm:$0xff] }
 0x152   :  { %792 = vmatpush.msrb.mxu3 %v781_v2  ;;  %812 = vmatpush.msrb.mxu0 %v782_v3  ;;  %v342_v17 = vpop.f32.mrf.mxu2  ;;  %v894_v63 = vld [vmem:[#allocation10 + $0x78] sm:$0xff]  ;;  %v957_v2 = vld [vmem:[#allocation11 + $0x70] sm:$0xff] }
 0x153   :  { %832 = vmatpush.msrb.mxu1 %v749_v5  ;;  %852 = vmatpush.msra.mxu2 %v750_v6  ;;  %364 = vst [vmem:[#allocation14 + $0x8] sm:$0xff] %v342_v17  ;;  %v973_v3 = vld [vmem:[#allocation11 + $0xf0] sm:$0xff]  ;;  %v908_v5 = vld [vmem:[#allocation10 + $0xe8] sm:$0xff] }
 0x154   :  { %643 = vmatmul.f32.vlgmr.msra.gmra.mxu3 %v262_v52  ;;  %663 = vmatmul.f32.vlgmr.msra.gmra.mxu0 %v262_v52  ;;  %v956_v6 = vld [vmem:[#allocation11 + $0x68] sm:$0xff] }
 0x155   :  { %683 = vmatmul.f32.vlgmr.msra.gmra.mxu1 %v262_v52  ;;  %703 = vmatmul.f32.vlgmr.msrb.gmra.mxu2 %v262_v52 }
 0x156   :  { %793 = vmatpush.msrb.mxu3 %v779_v7  ;;  %813 = vmatpush.msrb.mxu0 %v780_v8  ;;  %v972_v7 = vld [vmem:[#allocation11 + $0xe8] sm:$0xff] }
 0x157   :  { %833 = vmatpush.msrb.mxu1 %v747_v9  ;;  %853 = vmatpush.msra.mxu2 %v748_v10  ;;  %v892_v8 = vld [vmem:[#allocation10 + $0x68] sm:$0xff]  ;;  %v907_v9 = vld [vmem:[#allocation10 + $0xe0] sm:$0xff] }
 0x158   :  { %794 = vmatpush.msrb.mxu3 %v777_v11  ;;  %814 = vmatpush.msrb.mxu0 %v778_v12  ;;  %v955_v10 = vld [vmem:[#allocation11 + $0x60] sm:$0xff] }
 0x159   :  { %834 = vmatpush.msrb.mxu1 %v745_v13  ;;  %854 = vmatpush.msra.mxu2 %v746_v14  ;;  %v416_v59 = vpop.f32.mrf.mxu3  ;;  %v971_v11 = vld [vmem:[#allocation11 + $0xe0] sm:$0xff]  ;;  %v906_v13 = vld [vmem:[#allocation10 + $0xd8] sm:$0xff] }
 0x15a   :  { %795 = vmatpush.msrb.mxu3 %v775_v15  ;;  %815 = vmatpush.msrb.mxu0 %v776_v16  ;;  %v345_v34 = vpop.f32.mrf.mxu2  ;;  %v891_v12 = vld [vmem:[#allocation10 + $0x60] sm:$0xff]  ;;  %v954_v14 = vld [vmem:[#allocation11 + $0x58] sm:$0xff] }
 0x15b   :  { %835 = vmatpush.msrb.mxu1 %v743_v18  ;;  %855 = vmatpush.msra.mxu2 %v744_v19  ;;  %365 = vst [vmem:[#allocation14 + $0x10] sm:$0xff] %v345_v34  ;;  %v970_v15 = vld [vmem:[#allocation11 + $0xd8] sm:$0xff]  ;;  %v905_v18 = vld [vmem:[#allocation10 + $0xd0] sm:$0xff]  ;;  %v904_v19 = vld [vmem:[#allocation10 + $0xc8] sm:$0xff] }
 0x15c   :  { %796 = vmatpush.msrb.mxu3 %v773_v20  ;;  %816 = vmatpush.msrb.mxu0 %v774_v21  ;;  %v890_v16 = vld [vmem:[#allocation10 + $0x58] sm:$0xff]  ;;  %v903_v20 = vld [vmem:[#allocation10 + $0xc0] sm:$0xff]  ;;  %v900_v34 = vld [vmem:[#allocation10 + $0xa8] sm:$0xff] }
 0x15d   :  { %836 = vmatpush.msrb.mxu1 %v741_v22  ;;  %856 = vmatpush.msra.mxu2 %v742_v23  ;;  %v953_v23 = vld [vmem:[#allocation11 + $0x50] sm:$0xff] }
 0x15e   :  { %797 = vmatpush.msrb.mxu3 %v771_v24  ;;  %817 = vmatpush.msrb.mxu0 %v772_v25  ;;  %v969_v24 = vld [vmem:[#allocation11 + $0xd0] sm:$0xff] }
 0x15f   :  { %837 = vmatpush.msrb.mxu1 %v739_v26  ;;  %857 = vmatpush.msra.mxu2 %v740_v27  ;;  %v889_v25 = vld [vmem:[#allocation10 + $0x50] sm:$0xff]  ;;  %v902_v26 = vld [vmem:[#allocation10 + $0xb8] sm:$0xff]  ;;  %v952_v27 = vld [vmem:[#allocation11 + $0x48] sm:$0xff] }
 0x160   :  { %798 = vmatpush.msrb.mxu3 %v769_v28  ;;  %818 = vmatpush.msrb.mxu0 %v770_v29  ;;  %v968_v28 = vld [vmem:[#allocation11 + $0xc8] sm:$0xff] }
 0x161   :  { %838 = vmatpush.msrb.mxu1 %v737_v30  ;;  %858 = vmatpush.msra.mxu2 %v738_v31  ;;  %v888_v29 = vld [vmem:[#allocation10 + $0x48] sm:$0xff]  ;;  %v901_v30 = vld [vmem:[#allocation10 + $0xb0] sm:$0xff]  ;;  %v951_v31 = vld [vmem:[#allocation11 + $0x40] sm:$0xff] }
 0x162   :  { %799 = vmatpush.msrb.mxu3 %v767_v32  ;;  %819 = vmatpush.msrb.mxu0 %v768_v33  ;;  %v348_v52 = vpop.f32.mrf.mxu2  ;;  %v967_v32 = vld [vmem:[#allocation11 + $0xc0] sm:$0xff] }
 0x163   :  { %839 = vmatpush.msrb.mxu1 %v735_v35  ;;  %859 = vmatpush.msra.mxu2 %v736_v36  ;;  %366 = vst [vmem:[#allocation14 + $0x18] sm:$0xff] %v348_v52  ;;  %v887_v33 = vld [vmem:[#allocation10 + $0x40] sm:$0xff]  ;;  %v950_v35 = vld [vmem:[#allocation11 + $0x38] sm:$0xff] }
 0x164   :  { %800 = vmatpush.msrb.mxu3 %v765_v38  ;;  %820 = vmatpush.msrb.mxu0 %v766_v39  ;;  %v966_v36 = vld [vmem:[#allocation11 + $0xb8] sm:$0xff]  ;;  %v899_v38 = vld [vmem:[#allocation10 + $0xa0] sm:$0xff]  ;;  %v949_v39 = vld [vmem:[#allocation11 + $0x30] sm:$0xff] }
 0x165   :  { %840 = vmatpush.msrb.mxu1 %v733_v40  ;;  %860 = vmatpush.msra.mxu2 %v734_v41  ;;  %v965_v40 = vld [vmem:[#allocation11 + $0xb0] sm:$0xff]  ;;  %v962_v52 = vld [vmem:[#allocation11 + $0x98] sm:$0xff] }
 0x166   :  { %801 = vmatpush.msrb.mxu3 %v763_v42  ;;  %821 = vmatpush.msrb.mxu0 %v764_v43  ;;  %v885_v41 = vld [vmem:[#allocation10 + $0x30] sm:$0xff]  ;;  %v898_v42 = vld [vmem:[#allocation10 + $0x98] sm:$0xff]  ;;  %v948_v43 = vld [vmem:[#allocation11 + $0x28] sm:$0xff] }
 0x167   :  { %841 = vmatpush.msrb.mxu1 %v731_v44  ;;  %861 = vmatpush.msra.mxu2 %v732_v45  ;;  %v964_v44 = vld [vmem:[#allocation11 + $0xa8] sm:$0xff] }
 0x168   :  { %802 = vmatpush.msrb.mxu3 %v761_v46  ;;  %822 = vmatpush.msrb.mxu0 %v762_v47  ;;  %v884_v45 = vld [vmem:[#allocation10 + $0x28] sm:$0xff]  ;;  %v897_v46 = vld [vmem:[#allocation10 + $0x90] sm:$0xff]  ;;  %v947_v47 = vld [vmem:[#allocation11 + $0x20] sm:$0xff] }
 0x169   :  { %842 = vmatpush.msrb.mxu1 %v729_v48  ;;  %862 = vmatpush.msra.mxu2 %v730_v49  ;;  %v963_v48 = vld [vmem:[#allocation11 + $0xa0] sm:$0xff] }
 0x16a   :  { %803 = vmatpush.msrb.mxu3 %v759_v50  ;;  %823 = vmatpush.msrb.mxu0 %v760_v51  ;;  %v351_v0 = vpop.f32.mrf.mxu2  ;;  %v883_v49 = vld [vmem:[#allocation10 + $0x20] sm:$0xff]  ;;  %v896_v50 = vld [vmem:[#allocation10 + $0x88] sm:$0xff]  ;;  %v946_v51 = vld [vmem:[#allocation11 + $0x18] sm:$0xff] }
 0x16b   :  { %843 = vmatpush.msrb.mxu1 %v727_v53  ;;  %863 = vmatpush.msra.mxu2 %v728_v54  ;;  %367 = vst [vmem:[#allocation14 + $0x20] sm:$0xff] %v351_v0  ;;  %v882_v53 = vld [vmem:[#allocation10 + $0x18] sm:$0xff]  ;;  %v895_v54 = vld [vmem:[#allocation10 + $0x80] sm:$0xff] }
 0x16c   :  { %804 = vmatpush.msrb.mxu3 %v757_v55  ;;  %824 = vmatpush.msrb.mxu0 %v758_v56  ;;  %v945_v55 = vld [vmem:[#allocation11 + $0x10] sm:$0xff]  ;;  %v926_v0 = vld [vmem:[#allocation10 + $0x178] sm:$0xff] }
 0x16d   :  { %844 = vmatpush.msrb.mxu1 %v725_v57  ;;  %864 = vmatpush.msra.mxu2 %v726_v58  ;;  %v961_v56 = vld [vmem:[#allocation11 + $0x90] sm:$0xff]  ;;  %v944_v58 = vld [vmem:[#allocation11 + $0x8] sm:$0xff] }
 0x16e   :  { %805 = vmatmul.f32.vlgmr.msrb.gmra.mxu3 %v416_v59  ;;  %825 = vmatmul.f32.vlgmr.msrb.gmra.mxu0 %v416_v59  ;;  %v881_v57 = vld [vmem:[#allocation10 + $0x10] sm:$0xff]  ;;  %v960_v59 = vld [vmem:[#allocation11 + $0x88] sm:$0xff] }
 0x16f   :  { %845 = vmatmul.f32.vlgmr.msrb.gmra.mxu1 %v392_v37  ;;  %865 = vmatmul.f32.vlgmr.msra.gmra.mxu2 %v392_v37  ;;  %v886_v37 = vld [vmem:[#allocation10 + $0x38] sm:$0xff] }
 0x170   :  { %1035 = vmatpush.msrb.mxu2 %v910_v60  ;;  %975 = vmatpush.msra.mxu3 %v958_v61  ;;  %v880_v60 = vld [vmem:[#allocation10 + $0x8] sm:$0xff]  ;;  %v943_v61 = vld [vmem:[#allocation11] sm:$0xff] }
 0x171   :  { %995 = vmatpush.msra.mxu0 %v974_v62  ;;  %1015 = vmatpush.msra.mxu1 %v894_v63  ;;  %v959_v62 = vld [vmem:[#allocation11 + $0x80] sm:$0xff] }
 0x172   :  { %1036 = vmatpush.msrb.mxu2 %v909_v1  ;;  %976 = vmatpush.msra.mxu3 %v957_v2  ;;  %v354_v17 = vpop.f32.mrf.mxu2  ;;  %v879_v63 = vld [vmem:[#allocation10] sm:$0xff]  ;;  %v942_v1 = vld [vmem:[#allocation10 + $0x1f8] sm:$0xff]  ;;  %v925_v2 = vld [vmem:[#allocation10 + $0x170] sm:$0xff] }
 0x173   :  { %996 = vmatpush.msra.mxu0 %v973_v3  ;;  %1016 = vmatpush.msra.mxu1 %v893_v4  ;;  %368 = vst [vmem:[#allocation14 + $0x28] sm:$0xff] %v354_v17  ;;  %v941_v3 = vld [vmem:[#allocation10 + $0x1f0] sm:$0xff]  ;;  %v924_v4 = vld [vmem:[#allocation10 + $0x168] sm:$0xff]  ;;  %v919_v17 = vld [vmem:[#allocation10 + $0x140] sm:$0xff] }
 0x174   :  { %1037 = vmatpush.msrb.mxu2 %v908_v5  ;;  %977 = vmatpush.msra.mxu3 %v956_v6  ;;  %v940_v5 = vld [vmem:[#allocation10 + $0x1e8] sm:$0xff]  ;;  %v923_v6 = vld [vmem:[#allocation10 + $0x160] sm:$0xff] }
 0x175   :  { %997 = vmatpush.msra.mxu0 %v972_v7  ;;  %1017 = vmatpush.msra.mxu1 %v892_v8  ;;  %v939_v7 = vld [vmem:[#allocation10 + $0x1e0] sm:$0xff] }
 0x176   :  { %1038 = vmatpush.msrb.mxu2 %v907_v9  ;;  %978 = vmatpush.msra.mxu3 %v955_v10  ;;  %v922_v9 = vld [vmem:[#allocation10 + $0x158] sm:$0xff] }
 0x177   :  { %998 = vmatpush.msra.mxu0 %v971_v11  ;;  %1018 = vmatpush.msra.mxu1 %v891_v12  ;;  %v938_v10 = vld [vmem:[#allocation10 + $0x1d8] sm:$0xff]  ;;  %v921_v11 = vld [vmem:[#allocation10 + $0x150] sm:$0xff] }
 0x178   :  { %1039 = vmatpush.msrb.mxu2 %v906_v13  ;;  %979 = vmatpush.msra.mxu3 %v954_v14  ;;  %v937_v12 = vld [vmem:[#allocation10 + $0x1d0] sm:$0xff]  ;;  %v920_v13 = vld [vmem:[#allocation10 + $0x148] sm:$0xff] }
 0x179   :  { %999 = vmatpush.msra.mxu0 %v970_v15  ;;  %1019 = vmatpush.msra.mxu1 %v890_v16  ;;  %v936_v14 = vld [vmem:[#allocation10 + $0x1c8] sm:$0xff]  ;;  %v1588_v16 = vld [vmem:[%s1624_s12] sm:$0xf] }
 0x17a   :  { %1040 = vmatpush.msrb.mxu2 %v905_v18  ;;  %v357_v21 = vpop.f32.mrf.mxu2  ;;  %980 = vmatpush.msra.mxu3 %v953_v23  ;;  %v935_v18 = vld [vmem:[#allocation10 + $0x1c0] sm:$0xff] }
 0x17b   :  { %369 = vst [vmem:[#allocation14 + $0x30] sm:$0xff] %v357_v21  ;;  %1000 = vmatpush.msra.mxu0 %v969_v24  ;;  %1020 = vmatpush.msra.mxu1 %v889_v25  ;;  %v918_v21 = vld [vmem:[#allocation10 + $0x138] sm:$0xff]  ;;  %v917_v24 = vld [vmem:[#allocation10 + $0x130] sm:$0xff] }
 0x17c   :  { %1041 = vmatpush.msrb.mxu2 %v904_v19  ;;  %981 = vmatpush.msra.mxu3 %v952_v27  ;;  %v710_v19 = vperm.slane %v1588_v16, 1  ;;  %v933_v25 = vld [vmem:[#allocation10 + $0x1b0] sm:$0xff]  ;;  %v916_v27 = vld [vmem:[#allocation10 + $0x128] sm:$0xff] }
 0x17d   :  { %1001 = vmatpush.msra.mxu0 %v968_v28  ;;  %1021 = vmatpush.msra.mxu1 %v888_v29  ;;  %v932_v28 = vld [vmem:[#allocation10 + $0x1a8] sm:$0xff] }
 0x17e   :  { %1042 = vmatpush.msrb.mxu2 %v903_v20  ;;  %982 = vmatpush.msra.mxu3 %v951_v31 }
 0x17f   :  { %1002 = vmatpush.msra.mxu0 %v967_v32  ;;  %1022 = vmatpush.msra.mxu1 %v887_v33  ;;  %v915_v32 = vld [vmem:[#allocation10 + $0x120] sm:$0xff] }
 0x180   :  { %1043 = vmatpush.msrb.mxu2 %v902_v26  ;;  %983 = vmatpush.msra.mxu3 %v950_v35  ;;  %v931_v33 = vld [vmem:[#allocation10 + $0x1a0] sm:$0xff]  ;;  %v914_v35 = vld [vmem:[#allocation10 + $0x118] sm:$0xff] }
 0x181   :  { %1003 = vmatpush.msra.mxu0 %v966_v36  ;;  %1023 = vmatpush.msra.mxu1 %v886_v37  ;;  %v930_v36 = vld [vmem:[#allocation10 + $0x198] sm:$0xff]  ;;  %v913_v37 = vld [vmem:[#allocation10 + $0x110] sm:$0xff] }
 0x182   :  { %v360_v22 = vpop.f32.mrf.mxu2  ;;  %1044 = vmatpush.msrb.mxu2 %v901_v30  ;;  %984 = vmatpush.msra.mxu3 %v949_v39  ;;  %v709_v30 = vperm.slane %v1588_v16, 0  ;;  %v929_v39 = vld [vmem:[#allocation10 + $0x190] sm:$0xff] }
 0x183   :  { %370 = vst [vmem:[#allocation14 + $0x38] sm:$0xff] %v360_v22  ;;  %1004 = vmatpush.msra.mxu0 %v965_v40  ;;  %1024 = vmatpush.msra.mxu1 %v885_v41  ;;  %v934_v22 = vld [vmem:[#allocation10 + $0x1b8] sm:$0xff]  ;;  %v912_v40 = vld [vmem:[#allocation10 + $0x108] sm:$0xff] }
 0x184   :  { %1045 = vmatpush.msrb.mxu2 %v900_v34  ;;  %985 = vmatpush.msra.mxu3 %v948_v43  ;;  %v911_v43 = vld [vmem:[#allocation10 + $0x100] sm:$0xff]  ;;  %1126 = dma.vmem_to_hbm [thread:$0]  %s1119_s15, 1024, %s1121_s25, [#allocation15], %s1377_s27, %s1377_s27, %s1378_s28  }
 0x185   :  { %1005 = vmatpush.msra.mxu0 %v964_v44  ;;  %1025 = vmatpush.msra.mxu1 %v884_v45  ;;  %v927_v44 = vld [vmem:[#allocation10 + $0x180] sm:$0xff] }
 0x186   :  { %1046 = vmatpush.msrb.mxu2 %v899_v38  ;;  %986 = vmatpush.msra.mxu3 %v947_v47 }
 0x187   :  { %1006 = vmatpush.msra.mxu0 %v963_v48  ;;  %1026 = vmatpush.msra.mxu1 %v883_v49  ;;  %v869_v49 = vld [vmem:[%s1626_s14] sm:$0x3]  ;;  %s1388_s14 = smov [#allocation13]  }
 0x188   :  { %1047 = vmatpush.msrb.mxu2 %v898_v42  ;;  %987 = vmatpush.msra.mxu3 %v946_v51  ;;  %v928_v42 = vld [vmem:[#allocation10 + $0x188] sm:$0xff]  ;;  %s1108_s6 = sshll.u32 %s1388_s14, 4  ;;  %s1109_s6 = int_to_ptr.vmem [resolvable:$true] %s1108_s6 }
 0x189   :  { %1007 = vmatpush.msra.mxu0 %v962_v52  ;;  %1027 = vmatpush.msra.mxu1 %v882_v53  ;;  %v872_v53 = vperm.slane %v869_v49, 1  ;;  %1113 = dma.vmem_to_hbm [thread:$0]  %s1109_s6, 128, %s1111_s1, [#allocation4]  }
 0x18a   :  { %1048 = vmatpush.msrb.mxu2 %v897_v46  ;;  %988 = vmatpush.msra.mxu3 %v945_v55 }
 0x18b   :  { %1008 = vmatpush.msra.mxu0 %v961_v56  ;;  %1028 = vmatpush.msra.mxu1 %v881_v57 }
 0x18c   :  { %1049 = vmatpush.msrb.mxu2 %v896_v50  ;;  %989 = vmatpush.msra.mxu3 %v944_v58  ;;  %v871_v50 = vperm.slane %v869_v49, 0 }
 0x18d   :  { %1009 = vmatpush.msra.mxu0 %v960_v59  ;;  %1029 = vmatpush.msra.mxu1 %v880_v60 }
 0x18e   :  { %1050 = vmatpush.msrb.mxu2 %v895_v54  ;;  %990 = vmatpush.msra.mxu3 %v943_v61  ;;  %v711_v61 = vperm.slane %v1588_v16, 2 }
 0x18f   :  { %1010 = vmatpush.msra.mxu0 %v959_v62  ;;  %1030 = vmatpush.msra.mxu1 %v879_v63 }
 0x190   :  { %1055 = vmatpush.msrb.mxu3 %v926_v0  ;;  %v712_v0 = vperm.slane %v1588_v16, 3 }
 0x191   :  { %1075 = vmatpush.msrb.mxu0 %v942_v1 }
 0x192   :  { %1056 = vmatpush.msrb.mxu3 %v925_v2 }
 0x193   :  { %1076 = vmatpush.msrb.mxu0 %v941_v3 }
 0x194   :  { %1057 = vmatpush.msrb.mxu3 %v924_v4 }
 0x195   :  { %1077 = vmatpush.msrb.mxu0 %v940_v5 }
 0x196   :  { %1058 = vmatpush.msrb.mxu3 %v923_v6 }
 0x197   :  { %1078 = vmatpush.msrb.mxu0 %v939_v7 }
 0x198   :  { %1059 = vmatpush.msrb.mxu3 %v922_v9 }
 0x199   :  { %1079 = vmatpush.msrb.mxu0 %v938_v10 }
 0x19a   :  { %1060 = vmatpush.msrb.mxu3 %v921_v11 }
 0x19b   :  { %1080 = vmatpush.msrb.mxu0 %v937_v12 }
 0x19c   :  { %1061 = vmatpush.msrb.mxu3 %v920_v13 }
 0x19d   :  { %1081 = vmatpush.msrb.mxu0 %v936_v14 }
 0x19e   :  { %1062 = vmatpush.msrb.mxu3 %v919_v17 }
 0x19f   :  { %1082 = vmatpush.msrb.mxu0 %v935_v18 }
 0x1a0   :  { %1063 = vmatpush.msrb.mxu3 %v918_v21 }
 0x1a1   :  { %1083 = vmatpush.msrb.mxu0 %v934_v22 }
 0x1a2   :  { %1064 = vmatpush.msrb.mxu3 %v917_v24 }
 0x1a3   :  { %1084 = vmatpush.msrb.mxu0 %v933_v25 }
 0x1a4   :  { %1065 = vmatpush.msrb.mxu3 %v916_v27 }
 0x1a5   :  { %1085 = vmatpush.msrb.mxu0 %v932_v28 }
 0x1a6   :  { %1066 = vmatpush.msrb.mxu3 %v915_v32 }
 0x1a7   :  { %1086 = vmatpush.msrb.mxu0 %v931_v33 }
 0x1a8   :  { %1067 = vmatpush.msrb.mxu3 %v914_v35 }
 0x1a9   :  { %1087 = vmatpush.msrb.mxu0 %v930_v36 }
 0x1aa   :  { %1068 = vmatpush.msrb.mxu3 %v913_v37 }
 0x1ab   :  { %1088 = vmatpush.msrb.mxu0 %v929_v39 }
 0x1ac   :  { %1069 = vmatpush.msrb.mxu3 %v912_v40 }
 0x1ad   :  { %1089 = vmatpush.msrb.mxu0 %v928_v42 }
 0x1ae   :  { %1070 = vmatpush.msrb.mxu3 %v911_v43 }
 0x1af   :  { %1090 = vmatpush.msrb.mxu0 %v927_v44 }
 0x1c7   :  { %v584_v8 = vpop.f32.mrf.mxu0 }
 0x1c8   :  { %v604_v45 = vpop.f32.mrf.mxu1 }
 0x1cd   :  { %v564_v15 = vpop.f32.mrf.mxu3 }
 0x1ce   :  { %v624_v46 = vpop.f32.mrf.mxu2 }
 0x1d1   :  { %v664_v20 = vpop.f32.mrf.mxu0 }
 0x1d2   :  { %v665_v23 = vadd.f32 %v664_v20, %v584_v8  ;;  %v684_v47 = vpop.f32.mrf.mxu1 }
 0x1d3   :  { %v685_v60 = vadd.f32 %v684_v47, %v604_v45 }
 0x1d4   :  { %v718_v26 = vadd.f32 %v710_v19, %v665_v23 }
 0x1d5   :  { %v719_v2 = vadd.f32 %v711_v61, %v685_v60 }
 0x1d6   :  { %v722_v29 = vmax.f32 %v718_v26, 0.0 }
 0x1d7   :  { %v644_v31 = vpop.f32.mrf.mxu3  ;;  %v723_v4 = vmax.f32 %v719_v2, 0.0 }
 0x1d8   :  { %v645_v34 = vadd.f32 %v644_v31, %v564_v15  ;;  %1051 = vmatmul.f32.vlgmr.msrb.gmra.mxu2 %v722_v29  ;;  %v704_v48 = vpop.f32.mrf.mxu2  ;;  %v1171_v15 = vld [vmem:[%s1629_s17] ss:$0 sm:$0xff] }
 0x1d9   :  { %v705_v63 = vadd.f32 %v704_v48, %v624_v46 }
 0x1da   :  { %v717_v38 = vadd.f32 %v709_v30, %v645_v34 }
 0x1db   :  { %v720_v3 = vadd.f32 %v712_v0, %v705_v63 }
 0x1dc   :  { %v721_v41 = vmax.f32 %v717_v38, 0.0 }
 0x1dd   :  { %v724_v5 = vmax.f32 %v720_v3, 0.0 }
 0x1de   :  { %1031 = vmatmul.f32.vlgmr.msra.gmra.mxu1 %v721_v41 }
 0x1eb   :  { %v826_v54 = vpop.f32.mrf.mxu0 }
 0x1ec   :  { %v846_v51 = vpop.f32.mrf.mxu1 }
 0x1f1   :  { %v806_v52 = vpop.f32.mrf.mxu3 }
 0x1f2   :  { %v847_v55 = vadd.f32 %v846_v51, %v806_v52  ;;  %v866_v56 = vpop.f32.mrf.mxu2 }
 0x1f3   :  { %v867_v57 = vadd.f32 %v866_v56, %v826_v54 }
 0x1f4   :  { %v875_v58 = vadd.f32 %v871_v50, %v847_v55 }
 0x1f5   :  { %v876_v59 = vadd.f32 %v872_v53, %v867_v57 }
 0x1f6   :  { %v877_v62 = vmax.f32 %v875_v58, 0.0 }
 0x1f7   :  { %v878_v1 = vmax.f32 %v876_v59, 0.0 }
 0x1f8   :  { %991 = vmatmul.f32.vlgmr.msra.gmra.mxu3 %v877_v62 }
 0x1f9   :  { %1011 = vmatmul.f32.vlgmr.msra.gmra.mxu0 %v878_v1 }
 0x200   :  { %1071 = vmatmul.f32.vlgmr.msrb.gmra.mxu3 %v723_v4 }
 0x201   :  { %1091 = vmatmul.f32.vlgmr.msrb.gmra.mxu0 %v724_v5 }
 0x25b   :  { %v1032_v9 = vpop.f32.mrf.mxu1  ;;  %v1052_v11 = vpop.f32.mrf.mxu2 }
 0x276   :  { %v1012_v6 = vpop.f32.mrf.mxu0 }
 0x27b   :  { %v992_v7 = vpop.f32.mrf.mxu3 }
 0x27c   :  { %v1013_v8 = vadd.f32 %v1012_v6, %v992_v7 }
 0x27e   :  { %v1033_v10 = vadd.f32 %v1032_v9, %v1013_v8  ;;  %v1092_v16 = vpop.f32.mrf.mxu0 }
 0x280   :  { %v1053_v12 = vadd.f32 %v1052_v11, %v1033_v10 }
 0x283   :  { %v1072_v13 = vpop.f32.mrf.mxu3 }
 0x284   :  { %v1073_v14 = vadd.f32 %v1072_v13, %v1053_v12 }
 0x286   :  { %v1093_v17 = vadd.f32 %v1092_v16, %v1073_v14 }
 0x288   :  { %v1099_v18 = vadd.f32 %v1171_v15, %v1093_v17 }
 0x28a   :  { %1100 = vst [vmem:[%s1630_s18] sm:$0xff] %v1099_v18 }
 0x28b   :  { %1372 = dma.done.wait [#allocation4], 128  }
 0x28c   :  { %1373 = vsyncadd [#allocation4], 4294967168 }
 0x28d   :  { %1374 = dma.done.wait [#allocation15], 1024  }
 0x28e   :  { %1375 = vsyncadd [#allocation15], 4294966272 }
 0x28f   :  { %1137 = vsyncpa [#allocation3], 1 }
 0x290   :  { %1138 = vsyncpa [#allocation6], 1 }
 0x291   :  { %1139 = vsyncpa [#allocation9], 1 }
 0x292   :  { %1140 = vsyncpa [#allocation12], 1 }
 0x293   :  { %1141 = vsyncpa [#allocation4], 1 }
 0x294   :  { %1142 = vsyncpa [#allocation15], 1 }

</bundles_post_ra>
